<compile_context>
chip_gen: v7x
topology: tpu7x:2x2x1
jax: 0.10.0
libtpu: 0.0.40
codegen_flags: <defaults>
</compile_context>

<pallas_src>
import jax
import jax.numpy as jnp
import numpy as np
from jax import lax
from jax.experimental import pallas as pl
from jax.experimental.pallas import tpu as pltpu

FEATURES = 10        # len(FEATURES) in the torch module
COND = 3             # len(COND_FEATURES)
HIDDEN = 128         # HIDDEN_DIM
FC_HID = 128


def _lstm_disc_kernel(x_ref, cond_ref, wih_ref, whh_ref, b_ref,
                      w1h_ref, w1c_ref, b1_ref, w2_ref, b2_ref,
                      out_ref, gx_ref):
    T, TB, F = x_ref.shape
    H = whh_ref.shape[0]

    # ---- Prologue: time-parallel input projection, one MXU pass over all T steps. ----
    # (T, TB, F) -> (T*TB, F): leading-dim merge, lane dim untouched (layout no-op).
    x_all = x_ref[...].reshape(T * TB, F)
    gx_ref[...] = (jnp.dot(x_all, wih_ref[...], preferred_element_type=jnp.float32)
                   + b_ref[...])                              # (T*TB, 4H), gate order i,f,g,o

    # ---- Serial LSTM recurrence (only h @ Whh^T per step). ----
    def step(t, carry):
        h, c = carry
        row0 = pl.multiple_of(t * TB, TB)
        g = (gx_ref[pl.ds(row0, TB), :]
             + jnp.dot(h, whh_ref[...], preferred_element_type=jnp.float32))  # (TB, 4H)
        i_g = jax.nn.sigmoid(g[:, 0 * H:1 * H])
        f_g = jax.nn.sigmoid(g[:, 1 * H:2 * H])
        g_g = jnp.tanh(g[:, 2 * H:3 * H])
        o_g = jax.nn.sigmoid(g[:, 3 * H:4 * H])
        c_new = f_g * c + i_g * g_g
        h_new = o_g * jnp.tanh(c_new)
        return h_new, c_new

    h0 = jnp.zeros((TB, H), jnp.float32)
    c0 = jnp.zeros((TB, H), jnp.float32)
    h, _ = lax.fori_loop(0, T, step, (h0, c0), unroll=True)

    # ---- MLP head epilogue. fc1 over concat([h, cond]) == h @ W1h^T + cond @ W1c^T + b1. ----
    z1 = (jnp.dot(h, w1h_ref[...], preferred_element_type=jnp.float32)
          + jnp.dot(cond_ref[...], w1c_ref[...], preferred_element_type=jnp.float32)
          + b1_ref[...])
    a1 = jnp.maximum(z1, 0.0)                                  # ReLU
    # fc2 (width 1) on VPU + XLU lane-reduce instead of a <1%-fill MXU pass.
    z2 = jnp.sum(a1 * w2_ref[...], axis=-1, keepdims=True) + b2_ref[...]
    out_ref[...] = jax.nn.sigmoid(z2)                          # (TB, 1)


def time_series_discriminator(x, cond, params, *, batch_tile=8):
    """x: (B, T, F) f32 (batch-first, like nn.LSTM), cond: (B, C) f32 -> (B, 1) f32."""
    assert batch_tile % 8 == 0, "batch_tile must be a multiple of the f32 sublane height (8)"
    B, T, F = x.shape
    C = cond.shape[1]
    H = HIDDEN

    # Pad batch to a multiple of batch_tile (>= 8 sublanes); padded rows are discarded.
    B_pad = ((B + batch_tile - 1) // batch_tile) * batch_tile
    x_tbf = jnp.transpose(x, (1, 0, 2))                        # (T, B, F) -> time-major
    if B_pad != B:
        x_tbf = jnp.pad(x_tbf, ((0, 0), (0, B_pad - B), (0, 0)))
        cond_p = jnp.pad(cond, ((0, B_pad - B), (0, 0)))
    else:
        cond_p = cond

    wih_t = params["w_ih"].T                                   # (F, 4H)
    whh_t = params["w_hh"].T                                   # (H, 4H)
    b = (params["b_ih"] + params["b_hh"]).reshape(1, 4 * H)    # (1, 4H)
    w1_t = params["w_fc1"].T                                   # (H + C, FC_HID)
    w1h_t = w1_t[:H, :]                                        # (H, FC_HID)
    w1c_t = w1_t[H:, :]                                        # (C, FC_HID)
    b1 = params["b_fc1"].reshape(1, FC_HID)
    w2_row = params["w_fc2"].reshape(1, FC_HID)                # used as VPU row, not MXU RHS
    b2 = params["b_fc2"].reshape(1, 1)

    num_bt = B_pad // batch_tile

    grid_spec = pltpu.PrefetchScalarGridSpec(
        num_scalar_prefetch=0,
        grid=(num_bt,),                                        # independent batch tiles
        in_specs=[
            pl.BlockSpec((T, batch_tile, F), lambda bt: (0, bt, 0)),   # x (time-major)
            pl.BlockSpec((batch_tile, C), lambda bt: (bt, 0)),         # cond
            pl.BlockSpec((F, 4 * H), lambda bt: (0, 0)),               # Wih^T
            pl.BlockSpec((H, 4 * H), lambda bt: (0, 0)),               # Whh^T
            pl.BlockSpec((1, 4 * H), lambda bt: (0, 0)),               # b_ih + b_hh
            pl.BlockSpec((H, FC_HID), lambda bt: (0, 0)),              # W1h^T
            pl.BlockSpec((C, FC_HID), lambda bt: (0, 0)),              # W1c^T
            pl.BlockSpec((1, FC_HID), lambda bt: (0, 0)),              # b1
            pl.BlockSpec((1, FC_HID), lambda bt: (0, 0)),              # w2 row
            pl.BlockSpec((1, 1), lambda bt: (0, 0)),                   # b2
        ],
        out_specs=pl.BlockSpec((batch_tile, 1), lambda bt: (bt, 0)),
        scratch_shapes=[
            pltpu.VMEM((T * batch_tile, 4 * H), jnp.float32),  # precomputed input gates
        ],
    )

    out_full = pl.pallas_call(
        _lstm_disc_kernel,
        out_shape=jax.ShapeDtypeStruct((B_pad, 1), jnp.float32),
        grid_spec=grid_spec,
        compiler_params=pltpu.CompilerParams(
            dimension_semantics=("parallel",)),  # batch tiles are independent (v7x megacore)
    )(x_tbf, cond_p, wih_t, whh_t, b, w1h_t, w1c_t, b1, w2_row, b2)

    return out_full[:B]


def _reference(x, cond, params):
    """Pure-JAX reference mirroring torch.nn.LSTM + the fc head."""
    B, T, F = x.shape
    H = HIDDEN
    w_ih, w_hh = params["w_ih"], params["w_hh"]
    b = params["b_ih"] + params["b_hh"]
    h = jnp.zeros((B, H), jnp.float32)
    c = jnp.zeros((B, H), jnp.float32)
    for t in range(T):
        g = x[:, t, :] @ w_ih.T + h @ w_hh.T + b
        i = jax.nn.sigmoid(g[:, 0 * H:1 * H])
        f = jax.nn.sigmoid(g[:, 1 * H:2 * H])
        gg = jnp.tanh(g[:, 2 * H:3 * H])
        o = jax.nn.sigmoid(g[:, 3 * H:4 * H])
        c = f * c + i * gg
        h = o * jnp.tanh(c)
    z = jnp.concatenate([h, cond], axis=1)
    a1 = jnp.maximum(z @ params["w_fc1"].T + params["b_fc1"], 0.0)
    return jax.nn.sigmoid(a1 @ params["w_fc2"].T + params["b_fc2"])


def _init_params(key):
    ks = jax.random.split(key, 8)
    s = 0.1
    return {
        "w_ih": s * jax.random.normal(ks[0], (4 * HIDDEN, FEATURES), jnp.float32),
        "w_hh": s * jax.random.normal(ks[1], (4 * HIDDEN, HIDDEN), jnp.float32),
        "b_ih": s * jax.random.normal(ks[2], (4 * HIDDEN,), jnp.float32),
        "b_hh": s * jax.random.normal(ks[3], (4 * HIDDEN,), jnp.float32),
        "w_fc1": s * jax.random.normal(ks[4], (FC_HID, HIDDEN + COND), jnp.float32),
        "b_fc1": s * jax.random.normal(ks[5], (FC_HID,), jnp.float32),
        "w_fc2": s * jax.random.normal(ks[6], (1, FC_HID), jnp.float32),
        "b_fc2": s * jax.random.normal(ks[7], (1,), jnp.float32),
    }


if __name__ == "__main__":
    key = jax.random.PRNGKey(0)
    kx, kc, kp = jax.random.split(key, 3)

    B, T = 4, 8
    x = jax.random.normal(kx, (B, T, FEATURES), jnp.float32)
    cond = jax.random.normal(kc, (B, COND), jnp.float32)
    params = _init_params(kp)

    out = time_series_discriminator(x, cond, params)
    out = jax.block_until_ready(out)

    ref = jax.block_until_ready(_reference(x, cond, params))
    np.testing.assert_allclose(np.asarray(out), np.asarray(ref), rtol=1e-4, atol=1e-5)

    print("KERNEL_OK")
</pallas_src>

<mosaic_0001>
module attributes {stable_mosaic.version = 11 : i64} {
  func.func @_lstm_disc_kernel(%arg0: i32, %arg1: memref<8x8x10xf32, #tpu.memory_space<vmem>>, %arg2: memref<8x3xf32, #tpu.memory_space<vmem>>, %arg3: memref<10x512xf32, #tpu.memory_space<vmem>>, %arg4: memref<128x512xf32, #tpu.memory_space<vmem>>, %arg5: memref<1x512xf32, #tpu.memory_space<vmem>>, %arg6: memref<128x128xf32, #tpu.memory_space<vmem>>, %arg7: memref<3x128xf32, #tpu.memory_space<vmem>>, %arg8: memref<1x128xf32, #tpu.memory_space<vmem>>, %arg9: memref<1x128xf32, #tpu.memory_space<vmem>>, %arg10: memref<1x1xf32, #tpu.memory_space<vmem>>, %arg11: memref<8x1xf32, #tpu.memory_space<vmem>>, %arg12: memref<64x512xf32, #tpu.memory_space<vmem>>) attributes {dimension_semantics = [#tpu.dimension_semantics<parallel>], iteration_bounds = array<i64: 1>, scalar_prefetch = 0 : i64, scratch_operands = 1 : i64, tpu.core_type = #tpu.core_type<tc>, window_params = [{transform_indices = @transform_0, window_bounds = array<i64: 8, 8, 10>}, {transform_indices = @transform_1, window_bounds = array<i64: 8, 3>}, {pipeline_mode = #tpu.pipeline_mode<synchronous>, transform_indices = @transform_2, window_bounds = array<i64: 10, 512>}, {pipeline_mode = #tpu.pipeline_mode<synchronous>, transform_indices = @transform_3, window_bounds = array<i64: 128, 512>}, {pipeline_mode = #tpu.pipeline_mode<synchronous>, transform_indices = @transform_4, window_bounds = array<i64: 1, 512>}, {pipeline_mode = #tpu.pipeline_mode<synchronous>, transform_indices = @transform_5, window_bounds = array<i64: 128, 128>}, {pipeline_mode = #tpu.pipeline_mode<synchronous>, transform_indices = @transform_6, window_bounds = array<i64: 3, 128>}, {pipeline_mode = #tpu.pipeline_mode<synchronous>, transform_indices = @transform_7, window_bounds = array<i64: 1, 128>}, {pipeline_mode = #tpu.pipeline_mode<synchronous>, transform_indices = @transform_8, window_bounds = array<i64: 1, 128>}, {pipeline_mode = #tpu.pipeline_mode<synchronous>, transform_indices = @transform_9, window_bounds = array<i64: 1, 1>}, {transform_indices = @transform_10, window_bounds = array<i64: 8, 1>}]} {
    %c0 = arith.constant 0 : index
    %c0_0 = arith.constant 0 : index
    %c0_1 = arith.constant 0 : index
    %0 = vector.load %arg1[%c0, %c0_0, %c0_1] : memref<8x8x10xf32, #tpu.memory_space<vmem>>, vector<8x8x10xf32>
    %1 = vector.shape_cast %0 : vector<8x8x10xf32> to vector<64x10xf32>
    %c0_2 = arith.constant 0 : index
    %c0_3 = arith.constant 0 : index
    %2 = vector.load %arg3[%c0_2, %c0_3] : memref<10x512xf32, #tpu.memory_space<vmem>>, vector<10x512xf32>
    %cst = arith.constant dense<0.000000e+00> : vector<64x512xf32>
    %3 = tpu.matmul %1, %2, %cst {dimension_numbers = #tpu.dot_dimension_numbers<[1], [0], [0], [1], [0, 0, 1, 1], [], []>} : vector<64x10xf32>, vector<10x512xf32>, vector<64x512xf32> -> vector<64x512xf32>
    %c0_4 = arith.constant 0 : index
    %c0_5 = arith.constant 0 : index
    %4 = vector.load %arg5[%c0_4, %c0_5] : memref<1x512xf32, #tpu.memory_space<vmem>>, vector<1x512xf32>
    %5 = vector.broadcast %4 : vector<1x512xf32> to vector<64x512xf32>
    %6 = arith.addf %3, %5 : vector<64x512xf32>
    %c0_6 = arith.constant 0 : index
    %c0_7 = arith.constant 0 : index
    %7 = vector.load %arg12[%c0_6, %c0_7] : memref<64x512xf32, #tpu.memory_space<vmem>>, vector<64x512xf32>
    tpu.vector_store %arg12[%c0_6, %c0_7], %6 {strides = array<i32>} : memref<64x512xf32, #tpu.memory_space<vmem>>, vector<64x512xf32>,
    %cst_8 = arith.constant 0.000000e+00 : f32
    %8 = vector.broadcast %cst_8 : f32 to vector<8x128xf32>
    %cst_9 = arith.constant 0.000000e+00 : f32
    %9 = vector.broadcast %cst_9 : f32 to vector<8x128xf32>
    %c0_i32 = arith.constant 0 : i32
    %c8_i32 = arith.constant 8 : i32
    %10 = arith.muli %c0_i32, %c8_i32 : i32
    %11 = tpu.assume_multiple %10, 8 : i32
    %12 = arith.index_cast %11 : i32 to index
    %c0_10 = arith.constant 0 : index
    %13 = vector.load %arg12[%12, %c0_10] : memref<64x512xf32, #tpu.memory_space<vmem>>, vector<8x512xf32>
    %c0_11 = arith.constant 0 : index
    %c0_12 = arith.constant 0 : index
    %14 = vector.load %arg4[%c0_11, %c0_12] : memref<128x512xf32, #tpu.memory_space<vmem>>, vector<128x512xf32>
    %cst_13 = arith.constant dense<0.000000e+00> : vector<8x512xf32>
    %15 = tpu.matmul %8, %14, %cst_13 {dimension_numbers = #tpu.dot_dimension_numbers<[1], [0], [0], [1], [0, 0, 1, 1], [], []>} : vector<8x128xf32>, vector<128x512xf32>, vector<8x512xf32> -> vector<8x512xf32>
    %16 = arith.addf %13, %15 : vector<8x512xf32>
    %17 = vector.extract_strided_slice %16 {offsets = [0, 0], sizes = [8, 128], strides = [1, 1]} : vector<8x512xf32> to vector<8x128xf32>
    %18 = arith.negf %17 : vector<8x128xf32>
    %19 = math.exp %18 : vector<8x128xf32>
    %cst_14 = arith.constant 1.000000e+00 : f32
    %20 = vector.broadcast %cst_14 : f32 to vector<8x128xf32>
    %21 = arith.addf %20, %19 : vector<8x128xf32>
    %22 = arith.divf %20, %21 : vector<8x128xf32>
    %23 = vector.extract_strided_slice %16 {offsets = [0, 128], sizes = [8, 128], strides = [1, 1]} : vector<8x512xf32> to vector<8x128xf32>
    %24 = arith.negf %23 : vector<8x128xf32>
    %25 = math.exp %24 : vector<8x128xf32>
    %cst_15 = arith.constant 1.000000e+00 : f32
    %26 = vector.broadcast %cst_15 : f32 to vector<8x128xf32>
    %27 = arith.addf %26, %25 : vector<8x128xf32>
    %28 = arith.divf %26, %27 : vector<8x128xf32>
    %29 = vector.extract_strided_slice %16 {offsets = [0, 256], sizes = [8, 128], strides = [1, 1]} : vector<8x512xf32> to vector<8x128xf32>
    %30 = math.tanh %29 : vector<8x128xf32>
    %31 = vector.extract_strided_slice %16 {offsets = [0, 384], sizes = [8, 128], strides = [1, 1]} : vector<8x512xf32> to vector<8x128xf32>
    %32 = arith.negf %31 : vector<8x128xf32>
    %33 = math.exp %32 : vector<8x128xf32>
    %cst_16 = arith.constant 1.000000e+00 : f32
    %34 = vector.broadcast %cst_16 : f32 to vector<8x128xf32>
    %35 = arith.addf %34, %33 : vector<8x128xf32>
    %36 = arith.divf %34, %35 : vector<8x128xf32>
    %37 = arith.mulf %28, %9 : vector<8x128xf32>
    %38 = arith.mulf %22, %30 : vector<8x128xf32>
    %39 = arith.addf %37, %38 : vector<8x128xf32>
    %40 = math.tanh %39 : vector<8x128xf32>
    %41 = arith.mulf %36, %40 : vector<8x128xf32>
    %c1_i32 = arith.constant 1 : i32
    %c8_i32_17 = arith.constant 8 : i32
    %42 = arith.muli %c1_i32, %c8_i32_17 : i32
    %43 = tpu.assume_multiple %42, 8 : i32
    %44 = arith.index_cast %43 : i32 to index
    %c0_18 = arith.constant 0 : index
    %45 = vector.load %arg12[%44, %c0_18] : memref<64x512xf32, #tpu.memory_space<vmem>>, vector<8x512xf32>
    %c0_19 = arith.constant 0 : index
    %c0_20 = arith.constant 0 : index
    %46 = vector.load %arg4[%c0_19, %c0_20] : memref<128x512xf32, #tpu.memory_space<vmem>>, vector<128x512xf32>
    %cst_21 = arith.constant dense<0.000000e+00> : vector<8x512xf32>
    %47 = tpu.matmul %41, %46, %cst_21 {dimension_numbers = #tpu.dot_dimension_numbers<[1], [0], [0], [1], [0, 0, 1, 1], [], []>} : vector<8x128xf32>, vector<128x512xf32>, vector<8x512xf32> -> vector<8x512xf32>
    %48 = arith.addf %45, %47 : vector<8x512xf32>
    %49 = vector.extract_strided_slice %48 {offsets = [0, 0], sizes = [8, 128], strides = [1, 1]} : vector<8x512xf32> to vector<8x128xf32>
    %50 = arith.negf %49 : vector<8x128xf32>
    %51 = math.exp %50 : vector<8x128xf32>
    %cst_22 = arith.constant 1.000000e+00 : f32
    %52 = vector.broadcast %cst_22 : f32 to vector<8x128xf32>
    %53 = arith.addf %52, %51 : vector<8x128xf32>
    %54 = arith.divf %52, %53 : vector<8x128xf32>
    %55 = vector.extract_strided_slice %48 {offsets = [0, 128], sizes = [8, 128], strides = [1, 1]} : vector<8x512xf32> to vector<8x128xf32>
    %56 = arith.negf %55 : vector<8x128xf32>
    %57 = math.exp %56 : vector<8x128xf32>
    %cst_23 = arith.constant 1.000000e+00 : f32
    %58 = vector.broadcast %cst_23 : f32 to vector<8x128xf32>
    %59 = arith.addf %58, %57 : vector<8x128xf32>
    %60 = arith.divf %58, %59 : vector<8x128xf32>
    %61 = vector.extract_strided_slice %48 {offsets = [0, 256], sizes = [8, 128], strides = [1, 1]} : vector<8x512xf32> to vector<8x128xf32>
    %62 = math.tanh %61 : vector<8x128xf32>
    %63 = vector.extract_strided_slice %48 {offsets = [0, 384], sizes = [8, 128], strides = [1, 1]} : vector<8x512xf32> to vector<8x128xf32>
    %64 = arith.negf %63 : vector<8x128xf32>
    %65 = math.exp %64 : vector<8x128xf32>
    %cst_24 = arith.constant 1.000000e+00 : f32
    %66 = vector.broadcast %cst_24 : f32 to vector<8x128xf32>
    %67 = arith.addf %66, %65 : vector<8x128xf32>
    %68 = arith.divf %66, %67 : vector<8x128xf32>
    %69 = arith.mulf %60, %39 : vector<8x128xf32>
    %70 = arith.mulf %54, %62 : vector<8x128xf32>
    %71 = arith.addf %69, %70 : vector<8x128xf32>
    %72 = math.tanh %71 : vector<8x128xf32>
    %73 = arith.mulf %68, %72 : vector<8x128xf32>
    %c2_i32 = arith.constant 2 : i32
    %c8_i32_25 = arith.constant 8 : i32
    %74 = arith.muli %c2_i32, %c8_i32_25 : i32
    %75 = tpu.assume_multiple %74, 8 : i32
    %76 = arith.index_cast %75 : i32 to index
    %c0_26 = arith.constant 0 : index
    %77 = vector.load %arg12[%76, %c0_26] : memref<64x512xf32, #tpu.memory_space<vmem>>, vector<8x512xf32>
    %c0_27 = arith.constant 0 : index
    %c0_28 = arith.constant 0 : index
    %78 = vector.load %arg4[%c0_27, %c0_28] : memref<128x512xf32, #tpu.memory_space<vmem>>, vector<128x512xf32>
    %cst_29 = arith.constant dense<0.000000e+00> : vector<8x512xf32>
    %79 = tpu.matmul %73, %78, %cst_29 {dimension_numbers = #tpu.dot_dimension_numbers<[1], [0], [0], [1], [0, 0, 1, 1], [], []>} : vector<8x128xf32>, vector<128x512xf32>, vector<8x512xf32> -> vector<8x512xf32>
    %80 = arith.addf %77, %79 : vector<8x512xf32>
    %81 = vector.extract_strided_slice %80 {offsets = [0, 0], sizes = [8, 128], strides = [1, 1]} : vector<8x512xf32> to vector<8x128xf32>
    %82 = arith.negf %81 : vector<8x128xf32>
    %83 = math.exp %82 : vector<8x128xf32>
    %cst_30 = arith.constant 1.000000e+00 : f32
    %84 = vector.broadcast %cst_30 : f32 to vector<8x128xf32>
    %85 = arith.addf %84, %83 : vector<8x128xf32>
    %86 = arith.divf %84, %85 : vector<8x128xf32>
    %87 = vector.extract_strided_slice %80 {offsets = [0, 128], sizes = [8, 128], strides = [1, 1]} : vector<8x512xf32> to vector<8x128xf32>
    %88 = arith.negf %87 : vector<8x128xf32>
    %89 = math.exp %88 : vector<8x128xf32>
    %cst_31 = arith.constant 1.000000e+00 : f32
    %90 = vector.broadcast %cst_31 : f32 to vector<8x128xf32>
    %91 = arith.addf %90, %89 : vector<8x128xf32>
    %92 = arith.divf %90, %91 : vector<8x128xf32>
    %93 = vector.extract_strided_slice %80 {offsets = [0, 256], sizes = [8, 128], strides = [1, 1]} : vector<8x512xf32> to vector<8x128xf32>
    %94 = math.tanh %93 : vector<8x128xf32>
    %95 = vector.extract_strided_slice %80 {offsets = [0, 384], sizes = [8, 128], strides = [1, 1]} : vector<8x512xf32> to vector<8x128xf32>
    %96 = arith.negf %95 : vector<8x128xf32>
    %97 = math.exp %96 : vector<8x128xf32>
    %cst_32 = arith.constant 1.000000e+00 : f32
    %98 = vector.broadcast %cst_32 : f32 to vector<8x128xf32>
    %99 = arith.addf %98, %97 : vector<8x128xf32>
    %100 = arith.divf %98, %99 : vector<8x128xf32>
    %101 = arith.mulf %92, %71 : vector<8x128xf32>
    %102 = arith.mulf %86, %94 : vector<8x128xf32>
    %103 = arith.addf %101, %102 : vector<8x128xf32>
    %104 = math.tanh %103 : vector<8x128xf32>
    %105 = arith.mulf %100, %104 : vector<8x128xf32>
    %c3_i32 = arith.constant 3 : i32
    %c8_i32_33 = arith.constant 8 : i32
    %106 = arith.muli %c3_i32, %c8_i32_33 : i32
    %107 = tpu.assume_multiple %106, 8 : i32
    %108 = arith.index_cast %107 : i32 to index
    %c0_34 = arith.constant 0 : index
    %109 = vector.load %arg12[%108, %c0_34] : memref<64x512xf32, #tpu.memory_space<vmem>>, vector<8x512xf32>
    %c0_35 = arith.constant 0 : index
    %c0_36 = arith.constant 0 : index
    %110 = vector.load %arg4[%c0_35, %c0_36] : memref<128x512xf32, #tpu.memory_space<vmem>>, vector<128x512xf32>
    %cst_37 = arith.constant dense<0.000000e+00> : vector<8x512xf32>
    %111 = tpu.matmul %105, %110, %cst_37 {dimension_numbers = #tpu.dot_dimension_numbers<[1], [0], [0], [1], [0, 0, 1, 1], [], []>} : vector<8x128xf32>, vector<128x512xf32>, vector<8x512xf32> -> vector<8x512xf32>
    %112 = arith.addf %109, %111 : vector<8x512xf32>
    %113 = vector.extract_strided_slice %112 {offsets = [0, 0], sizes = [8, 128], strides = [1, 1]} : vector<8x512xf32> to vector<8x128xf32>
    %114 = arith.negf %113 : vector<8x128xf32>
    %115 = math.exp %114 : vector<8x128xf32>
    %cst_38 = arith.constant 1.000000e+00 : f32
    %116 = vector.broadcast %cst_38 : f32 to vector<8x128xf32>
    %117 = arith.addf %116, %115 : vector<8x128xf32>
    %118 = arith.divf %116, %117 : vector<8x128xf32>
    %119 = vector.extract_strided_slice %112 {offsets = [0, 128], sizes = [8, 128], strides = [1, 1]} : vector<8x512xf32> to vector<8x128xf32>
    %120 = arith.negf %119 : vector<8x128xf32>
    %121 = math.exp %120 : vector<8x128xf32>
    %cst_39 = arith.constant 1.000000e+00 : f32
    %122 = vector.broadcast %cst_39 : f32 to vector<8x128xf32>
    %123 = arith.addf %122, %121 : vector<8x128xf32>
    %124 = arith.divf %122, %123 : vector<8x128xf32>
    %125 = vector.extract_strided_slice %112 {offsets = [0, 256], sizes = [8, 128], strides = [1, 1]} : vector<8x512xf32> to vector<8x128xf32>
    %126 = math.tanh %125 : vector<8x128xf32>
    %127 = vector.extract_strided_slice %112 {offsets = [0, 384], sizes = [8, 128], strides = [1, 1]} : vector<8x512xf32> to vector<8x128xf32>
    %128 = arith.negf %127 : vector<8x128xf32>
    %129 = math.exp %128 : vector<8x128xf32>
    %cst_40 = arith.constant 1.000000e+00 : f32
    %130 = vector.broadcast %cst_40 : f32 to vector<8x128xf32>
    %131 = arith.addf %130, %129 : vector<8x128xf32>
    %132 = arith.divf %130, %131 : vector<8x128xf32>
    %133 = arith.mulf %124, %103 : vector<8x128xf32>
    %134 = arith.mulf %118, %126 : vector<8x128xf32>
    %135 = arith.addf %133, %134 : vector<8x128xf32>
    %136 = math.tanh %135 : vector<8x128xf32>
    %137 = arith.mulf %132, %136 : vector<8x128xf32>
    %c4_i32 = arith.constant 4 : i32
    %c8_i32_41 = arith.constant 8 : i32
    %138 = arith.muli %c4_i32, %c8_i32_41 : i32
    %139 = tpu.assume_multiple %138, 8 : i32
    %140 = arith.index_cast %139 : i32 to index
    %c0_42 = arith.constant 0 : index
    %141 = vector.load %arg12[%140, %c0_42] : memref<64x512xf32, #tpu.memory_space<vmem>>, vector<8x512xf32>
    %c0_43 = arith.constant 0 : index
    %c0_44 = arith.constant 0 : index
    %142 = vector.load %arg4[%c0_43, %c0_44] : memref<128x512xf32, #tpu.memory_space<vmem>>, vector<128x512xf32>
    %cst_45 = arith.constant dense<0.000000e+00> : vector<8x512xf32>
    %143 = tpu.matmul %137, %142, %cst_45 {dimension_numbers = #tpu.dot_dimension_numbers<[1], [0], [0], [1], [0, 0, 1, 1], [], []>} : vector<8x128xf32>, vector<128x512xf32>, vector<8x512xf32> -> vector<8x512xf32>
    %144 = arith.addf %141, %143 : vector<8x512xf32>
    %145 = vector.extract_strided_slice %144 {offsets = [0, 0], sizes = [8, 128], strides = [1, 1]} : vector<8x512xf32> to vector<8x128xf32>
    %146 = arith.negf %145 : vector<8x128xf32>
    %147 = math.exp %146 : vector<8x128xf32>
    %cst_46 = arith.constant 1.000000e+00 : f32
    %148 = vector.broadcast %cst_46 : f32 to vector<8x128xf32>
    %149 = arith.addf %148, %147 : vector<8x128xf32>
    %150 = arith.divf %148, %149 : vector<8x128xf32>
    %151 = vector.extract_strided_slice %144 {offsets = [0, 128], sizes = [8, 128], strides = [1, 1]} : vector<8x512xf32> to vector<8x128xf32>
    %152 = arith.negf %151 : vector<8x128xf32>
    %153 = math.exp %152 : vector<8x128xf32>
    %cst_47 = arith.constant 1.000000e+00 : f32
    %154 = vector.broadcast %cst_47 : f32 to vector<8x128xf32>
    %155 = arith.addf %154, %153 : vector<8x128xf32>
    %156 = arith.divf %154, %155 : vector<8x128xf32>
    %157 = vector.extract_strided_slice %144 {offsets = [0, 256], sizes = [8, 128], strides = [1, 1]} : vector<8x512xf32> to vector<8x128xf32>
    %158 = math.tanh %157 : vector<8x128xf32>
    %159 = vector.extract_strided_slice %144 {offsets = [0, 384], sizes = [8, 128], strides = [1, 1]} : vector<8x512xf32> to vector<8x128xf32>
    %160 = arith.negf %159 : vector<8x128xf32>
    %161 = math.exp %160 : vector<8x128xf32>
    %cst_48 = arith.constant 1.000000e+00 : f32
    %162 = vector.broadcast %cst_48 : f32 to vector<8x128xf32>
    %163 = arith.addf %162, %161 : vector<8x128xf32>
    %164 = arith.divf %162, %163 : vector<8x128xf32>
    %165 = arith.mulf %156, %135 : vector<8x128xf32>
    %166 = arith.mulf %150, %158 : vector<8x128xf32>
    %167 = arith.addf %165, %166 : vector<8x128xf32>
    %168 = math.tanh %167 : vector<8x128xf32>
    %169 = arith.mulf %164, %168 : vector<8x128xf32>
    %c5_i32 = arith.constant 5 : i32
    %c8_i32_49 = arith.constant 8 : i32
    %170 = arith.muli %c5_i32, %c8_i32_49 : i32
    %171 = tpu.assume_multiple %170, 8 : i32
    %172 = arith.index_cast %171 : i32 to index
    %c0_50 = arith.constant 0 : index
    %173 = vector.load %arg12[%172, %c0_50] : memref<64x512xf32, #tpu.memory_space<vmem>>, vector<8x512xf32>
    %c0_51 = arith.constant 0 : index
    %c0_52 = arith.constant 0 : index
    %174 = vector.load %arg4[%c0_51, %c0_52] : memref<128x512xf32, #tpu.memory_space<vmem>>, vector<128x512xf32>
    %cst_53 = arith.constant dense<0.000000e+00> : vector<8x512xf32>
    %175 = tpu.matmul %169, %174, %cst_53 {dimension_numbers = #tpu.dot_dimension_numbers<[1], [0], [0], [1], [0, 0, 1, 1], [], []>} : vector<8x128xf32>, vector<128x512xf32>, vector<8x512xf32> -> vector<8x512xf32>
    %176 = arith.addf %173, %175 : vector<8x512xf32>
    %177 = vector.extract_strided_slice %176 {offsets = [0, 0], sizes = [8, 128], strides = [1, 1]} : vector<8x512xf32> to vector<8x128xf32>
    %178 = arith.negf %177 : vector<8x128xf32>
    %179 = math.exp %178 : vector<8x128xf32>
    %cst_54 = arith.constant 1.000000e+00 : f32
    %180 = vector.broadcast %cst_54 : f32 to vector<8x128xf32>
    %181 = arith.addf %180, %179 : vector<8x128xf32>
    %182 = arith.divf %180, %181 : vector<8x128xf32>
    %183 = vector.extract_strided_slice %176 {offsets = [0, 128], sizes = [8, 128], strides = [1, 1]} : vector<8x512xf32> to vector<8x128xf32>
    %184 = arith.negf %183 : vector<8x128xf32>
    %185 = math.exp %184 : vector<8x128xf32>
    %cst_55 = arith.constant 1.000000e+00 : f32
    %186 = vector.broadcast %cst_55 : f32 to vector<8x128xf32>
    %187 = arith.addf %186, %185 : vector<8x128xf32>
    %188 = arith.divf %186, %187 : vector<8x128xf32>
    %189 = vector.extract_strided_slice %176 {offsets = [0, 256], sizes = [8, 128], strides = [1, 1]} : vector<8x512xf32> to vector<8x128xf32>
    %190 = math.tanh %189 : vector<8x128xf32>
    %191 = vector.extract_strided_slice %176 {offsets = [0, 384], sizes = [8, 128], strides = [1, 1]} : vector<8x512xf32> to vector<8x128xf32>
    %192 = arith.negf %191 : vector<8x128xf32>
    %193 = math.exp %192 : vector<8x128xf32>
    %cst_56 = arith.constant 1.000000e+00 : f32
    %194 = vector.broadcast %cst_56 : f32 to vector<8x128xf32>
    %195 = arith.addf %194, %193 : vector<8x128xf32>
    %196 = arith.divf %194, %195 : vector<8x128xf32>
    %197 = arith.mulf %188, %167 : vector<8x128xf32>
    %198 = arith.mulf %182, %190 : vector<8x128xf32>
    %199 = arith.addf %197, %198 : vector<8x128xf32>
    %200 = math.tanh %199 : vector<8x128xf32>
    %201 = arith.mulf %196, %200 : vector<8x128xf32>
    %c6_i32 = arith.constant 6 : i32
    %c8_i32_57 = arith.constant 8 : i32
    %202 = arith.muli %c6_i32, %c8_i32_57 : i32
    %203 = tpu.assume_multiple %202, 8 : i32
    %204 = arith.index_cast %203 : i32 to index
    %c0_58 = arith.constant 0 : index
    %205 = vector.load %arg12[%204, %c0_58] : memref<64x512xf32, #tpu.memory_space<vmem>>, vector<8x512xf32>
    %c0_59 = arith.constant 0 : index
    %c0_60 = arith.constant 0 : index
    %206 = vector.load %arg4[%c0_59, %c0_60] : memref<128x512xf32, #tpu.memory_space<vmem>>, vector<128x512xf32>
    %cst_61 = arith.constant dense<0.000000e+00> : vector<8x512xf32>
    %207 = tpu.matmul %201, %206, %cst_61 {dimension_numbers = #tpu.dot_dimension_numbers<[1], [0], [0], [1], [0, 0, 1, 1], [], []>} : vector<8x128xf32>, vector<128x512xf32>, vector<8x512xf32> -> vector<8x512xf32>
    %208 = arith.addf %205, %207 : vector<8x512xf32>
    %209 = vector.extract_strided_slice %208 {offsets = [0, 0], sizes = [8, 128], strides = [1, 1]} : vector<8x512xf32> to vector<8x128xf32>
    %210 = arith.negf %209 : vector<8x128xf32>
    %211 = math.exp %210 : vector<8x128xf32>
    %cst_62 = arith.constant 1.000000e+00 : f32
    %212 = vector.broadcast %cst_62 : f32 to vector<8x128xf32>
    %213 = arith.addf %212, %211 : vector<8x128xf32>
    %214 = arith.divf %212, %213 : vector<8x128xf32>
    %215 = vector.extract_strided_slice %208 {offsets = [0, 128], sizes = [8, 128], strides = [1, 1]} : vector<8x512xf32> to vector<8x128xf32>
    %216 = arith.negf %215 : vector<8x128xf32>
    %217 = math.exp %216 : vector<8x128xf32>
    %cst_63 = arith.constant 1.000000e+00 : f32
    %218 = vector.broadcast %cst_63 : f32 to vector<8x128xf32>
    %219 = arith.addf %218, %217 : vector<8x128xf32>
    %220 = arith.divf %218, %219 : vector<8x128xf32>
    %221 = vector.extract_strided_slice %208 {offsets = [0, 256], sizes = [8, 128], strides = [1, 1]} : vector<8x512xf32> to vector<8x128xf32>
    %222 = math.tanh %221 : vector<8x128xf32>
    %223 = vector.extract_strided_slice %208 {offsets = [0, 384], sizes = [8, 128], strides = [1, 1]} : vector<8x512xf32> to vector<8x128xf32>
    %224 = arith.negf %223 : vector<8x128xf32>
    %225 = math.exp %224 : vector<8x128xf32>
    %cst_64 = arith.constant 1.000000e+00 : f32
    %226 = vector.broadcast %cst_64 : f32 to vector<8x128xf32>
    %227 = arith.addf %226, %225 : vector<8x128xf32>
    %228 = arith.divf %226, %227 : vector<8x128xf32>
    %229 = arith.mulf %220, %199 : vector<8x128xf32>
    %230 = arith.mulf %214, %222 : vector<8x128xf32>
    %231 = arith.addf %229, %230 : vector<8x128xf32>
    %232 = math.tanh %231 : vector<8x128xf32>
    %233 = arith.mulf %228, %232 : vector<8x128xf32>
    %c7_i32 = arith.constant 7 : i32
    %c8_i32_65 = arith.constant 8 : i32
    %234 = arith.muli %c7_i32, %c8_i32_65 : i32
    %235 = tpu.assume_multiple %234, 8 : i32
    %236 = arith.index_cast %235 : i32 to index
    %c0_66 = arith.constant 0 : index
    %237 = vector.load %arg12[%236, %c0_66] : memref<64x512xf32, #tpu.memory_space<vmem>>, vector<8x512xf32>
    %c0_67 = arith.constant 0 : index
    %c0_68 = arith.constant 0 : index
    %238 = vector.load %arg4[%c0_67, %c0_68] : memref<128x512xf32, #tpu.memory_space<vmem>>, vector<128x512xf32>
    %cst_69 = arith.constant dense<0.000000e+00> : vector<8x512xf32>
    %239 = tpu.matmul %233, %238, %cst_69 {dimension_numbers = #tpu.dot_dimension_numbers<[1], [0], [0], [1], [0, 0, 1, 1], [], []>} : vector<8x128xf32>, vector<128x512xf32>, vector<8x512xf32> -> vector<8x512xf32>
    %240 = arith.addf %237, %239 : vector<8x512xf32>
    %241 = vector.extract_strided_slice %240 {offsets = [0, 0], sizes = [8, 128], strides = [1, 1]} : vector<8x512xf32> to vector<8x128xf32>
    %242 = arith.negf %241 : vector<8x128xf32>
    %243 = math.exp %242 : vector<8x128xf32>
    %cst_70 = arith.constant 1.000000e+00 : f32
    %244 = vector.broadcast %cst_70 : f32 to vector<8x128xf32>
    %245 = arith.addf %244, %243 : vector<8x128xf32>
    %246 = arith.divf %244, %245 : vector<8x128xf32>
    %247 = vector.extract_strided_slice %240 {offsets = [0, 128], sizes = [8, 128], strides = [1, 1]} : vector<8x512xf32> to vector<8x128xf32>
    %248 = arith.negf %247 : vector<8x128xf32>
    %249 = math.exp %248 : vector<8x128xf32>
    %cst_71 = arith.constant 1.000000e+00 : f32
    %250 = vector.broadcast %cst_71 : f32 to vector<8x128xf32>
    %251 = arith.addf %250, %249 : vector<8x128xf32>
    %252 = arith.divf %250, %251 : vector<8x128xf32>
    %253 = vector.extract_strided_slice %240 {offsets = [0, 256], sizes = [8, 128], strides = [1, 1]} : vector<8x512xf32> to vector<8x128xf32>
    %254 = math.tanh %253 : vector<8x128xf32>
    %255 = vector.extract_strided_slice %240 {offsets = [0, 384], sizes = [8, 128], strides = [1, 1]} : vector<8x512xf32> to vector<8x128xf32>
    %256 = arith.negf %255 : vector<8x128xf32>
    %257 = math.exp %256 : vector<8x128xf32>
    %cst_72 = arith.constant 1.000000e+00 : f32
    %258 = vector.broadcast %cst_72 : f32 to vector<8x128xf32>
    %259 = arith.addf %258, %257 : vector<8x128xf32>
    %260 = arith.divf %258, %259 : vector<8x128xf32>
    %261 = arith.mulf %252, %231 : vector<8x128xf32>
    %262 = arith.mulf %246, %254 : vector<8x128xf32>
    %263 = arith.addf %261, %262 : vector<8x128xf32>
    %264 = math.tanh %263 : vector<8x128xf32>
    %265 = arith.mulf %260, %264 : vector<8x128xf32>
    %c8_i32_73 = arith.constant 8 : i32
    %c0_74 = arith.constant 0 : index
    %c0_75 = arith.constant 0 : index
    %266 = vector.load %arg6[%c0_74, %c0_75] : memref<128x128xf32, #tpu.memory_space<vmem>>, vector<128x128xf32>
    %cst_76 = arith.constant dense<0.000000e+00> : vector<8x128xf32>
    %267 = tpu.matmul %265, %266, %cst_76 {dimension_numbers = #tpu.dot_dimension_numbers<[1], [0], [0], [1], [0, 0, 1, 1], [], []>} : vector<8x128xf32>, vector<128x128xf32>, vector<8x128xf32> -> vector<8x128xf32>
    %c0_77 = arith.constant 0 : index
    %c0_78 = arith.constant 0 : index
    %268 = vector.load %arg2[%c0_77, %c0_78] : memref<8x3xf32, #tpu.memory_space<vmem>>, vector<8x3xf32>
    %c0_79 = arith.constant 0 : index
    %c0_80 = arith.constant 0 : index
    %269 = vector.load %arg7[%c0_79, %c0_80] : memref<3x128xf32, #tpu.memory_space<vmem>>, vector<3x128xf32>
    %cst_81 = arith.constant dense<0.000000e+00> : vector<8x128xf32>
    %270 = tpu.matmul %268, %269, %cst_81 {dimension_numbers = #tpu.dot_dimension_numbers<[1], [0], [0], [1], [0, 0, 1, 1], [], []>} : vector<8x3xf32>, vector<3x128xf32>, vector<8x128xf32> -> vector<8x128xf32>
    %271 = arith.addf %267, %270 : vector<8x128xf32>
    %c0_82 = arith.constant 0 : index
    %c0_83 = arith.constant 0 : index
    %272 = vector.load %arg8[%c0_82, %c0_83] : memref<1x128xf32, #tpu.memory_space<vmem>>, vector<1x128xf32>
    %273 = vector.broadcast %272 : vector<1x128xf32> to vector<8x128xf32>
    %274 = arith.addf %271, %273 : vector<8x128xf32>
    %cst_84 = arith.constant 0.000000e+00 : f32
    %275 = vector.broadcast %cst_84 : f32 to vector<8x128xf32>
    %276 = arith.maximumf %274, %275 : vector<8x128xf32>
    %c0_85 = arith.constant 0 : index
    %c0_86 = arith.constant 0 : index
    %277 = vector.load %arg9[%c0_85, %c0_86] : memref<1x128xf32, #tpu.memory_space<vmem>>, vector<1x128xf32>
    %278 = vector.broadcast %277 : vector<1x128xf32> to vector<8x128xf32>
    %279 = arith.mulf %276, %278 : vector<8x128xf32>
    %cst_87 = arith.constant dense<0.000000e+00> : vector<8xf32>
    %280 = vector.multi_reduction <add>, %279, %cst_87 [1] : vector<8x128xf32> to vector<8xf32>
    %281 = vector.shape_cast %280 : vector<8xf32> to vector<8x1xf32>
    %c0_88 = arith.constant 0 : index
    %c0_89 = arith.constant 0 : index
    %282 = vector.load %arg10[%c0_88, %c0_89] : memref<1x1xf32, #tpu.memory_space<vmem>>, vector<1x1xf32>
    %283 = vector.broadcast %282 : vector<1x1xf32> to vector<8x1xf32>
    %284 = arith.addf %281, %283 : vector<8x1xf32>
    %285 = arith.negf %284 : vector<8x1xf32>
    %286 = math.exp %285 : vector<8x1xf32>
    %cst_90 = arith.constant 1.000000e+00 : f32
    %287 = vector.broadcast %cst_90 : f32 to vector<8x1xf32>
    %288 = arith.addf %287, %286 : vector<8x1xf32>
    %289 = arith.divf %287, %288 : vector<8x1xf32>
    %c0_91 = arith.constant 0 : index
    %c0_92 = arith.constant 0 : index
    %290 = vector.load %arg11[%c0_91, %c0_92] : memref<8x1xf32, #tpu.memory_space<vmem>>, vector<8x1xf32>
    tpu.vector_store %arg11[%c0_91, %c0_92], %289 {strides = array<i32>} : memref<8x1xf32, #tpu.memory_space<vmem>>, vector<8x1xf32>,
    return
  }
  func.func @transform_0(%arg0: i32) -> (i32, i32, i32) {
    %c0_i32 = arith.constant 0 : i32
    %c0_i32_0 = arith.constant 0 : i32
    %c0_i32_1 = arith.constant 0 : i32
    return %c0_i32, %arg0, %c0_i32_0 : i32, i32, i32
  }
  func.func @transform_1(%arg0: i32) -> (i32, i32) {
    %c0_i32 = arith.constant 0 : i32
    %c0_i32_0 = arith.constant 0 : i32
    return %arg0, %c0_i32 : i32, i32
  }
  func.func @transform_2(%arg0: i32) -> (i32, i32) {
    %c0_i32 = arith.constant 0 : i32
    %c0_i32_0 = arith.constant 0 : i32
    %c0_i32_1 = arith.constant 0 : i32
    return %c0_i32, %c0_i32_0 : i32, i32
  }
  func.func @transform_3(%arg0: i32) -> (i32, i32) {
    %c0_i32 = arith.constant 0 : i32
    %c0_i32_0 = arith.constant 0 : i32
    %c0_i32_1 = arith.constant 0 : i32
    return %c0_i32, %c0_i32_0 : i32, i32
  }
  func.func @transform_4(%arg0: i32) -> (i32, i32) {
    %c0_i32 = arith.constant 0 : i32
    %c0_i32_0 = arith.constant 0 : i32
    %c0_i32_1 = arith.constant 0 : i32
    return %c0_i32, %c0_i32_0 : i32, i32
  }
  func.func @transform_5(%arg0: i32) -> (i32, i32) {
    %c0_i32 = arith.constant 0 : i32
    %c0_i32_0 = arith.constant 0 : i32
    %c0_i32_1 = arith.constant 0 : i32
    return %c0_i32, %c0_i32_0 : i32, i32
  }
  func.func @transform_6(%arg0: i32) -> (i32, i32) {
    %c0_i32 = arith.constant 0 : i32
    %c0_i32_0 = arith.constant 0 : i32
    %c0_i32_1 = arith.constant 0 : i32
    return %c0_i32, %c0_i32_0 : i32, i32
  }
  func.func @transform_7(%arg0: i32) -> (i32, i32) {
    %c0_i32 = arith.constant 0 : i32
    %c0_i32_0 = arith.constant 0 : i32
    %c0_i32_1 = arith.constant 0 : i32
    return %c0_i32, %c0_i32_0 : i32, i32
  }
  func.func @transform_8(%arg0: i32) -> (i32, i32) {
    %c0_i32 = arith.constant 0 : i32
    %c0_i32_0 = arith.constant 0 : i32
    %c0_i32_1 = arith.constant 0 : i32
    return %c0_i32, %c0_i32_0 : i32, i32
  }
  func.func @transform_9(%arg0: i32) -> (i32, i32) {
    %c0_i32 = arith.constant 0 : i32
    %c0_i32_0 = arith.constant 0 : i32
    %c0_i32_1 = arith.constant 0 : i32
    return %c0_i32, %c0_i32_0 : i32, i32
  }
  func.func @transform_10(%arg0: i32) -> (i32, i32) {
    %c0_i32 = arith.constant 0 : i32
    %c0_i32_0 = arith.constant 0 : i32
    return %arg0, %c0_i32 : i32, i32
  }
}

</mosaic_0001>

<bundles_post_ra>
// kernel: tpu_custom_call.1
= control target key start
LH: loop header
LB: loop body
LE: loop exit
PB: predicated region body
PF: predicated region fallthrough
CT: control target
= control target key end

     0   :  { %s3688_s0 = inlined_call_operand.hbm [shape: f32[8,8,10], index: 0, kind: input, shape index: {}]   ;;  %s3689_s1 = inlined_call_operand.vmem [shape: f32[8,3], index: 1, kind: input, shape index: {}]   ;;  %s3690_s2 = inlined_call_operand.hbm [shape: f32[10,512], index: 2, kind: input, shape index: {}]   ;;  %s3691_s3 = inlined_call_operand.hbm [shape: f32[128,512], index: 3, kind: input, shape index: {}]   ;;  %s3692_s4 = inlined_call_operand.vmem [shape: f32[1,512], index: 4, kind: input, shape index: {}]   ;;  %s3693_s5 = inlined_call_operand.hbm [shape: f32[128,128], index: 5, kind: input, shape index: {}]   ;;  %s3694_s6 = inlined_call_operand.vmem [shape: f32[3,128], index: 6, kind: input, shape index: {}]   ;;  %s3695_s7 = inlined_call_operand.vmem [shape: f32[1,128], index: 7, kind: input, shape index: {}]   ;;  %s3696_s8 = inlined_call_operand.vmem [shape: f32[1,128], index: 8, kind: input, shape index: {}]   ;;  %s3697_s9 = inlined_call_operand.<no memory space> [shape: f32[1,1], index: 9, kind: input, shape index: {}]   ;;  %s3698_s10 = inlined_call_operand.vmem [shape: f32[8,1], index: 10, kind: output, shape index: {}]  }
   0x1   :  { %v15_v0 = vstv %s3697_s9 }
   0x2   :  { %16 = vst [vmem:[#allocation3] sm:$0x1] %v15_v0 }
   0x3   :  { %17 = vsyncpa [#allocation5], 0 }
   0x4   :  { %18 = vsyncpa [#allocation7], 0 }
   0x5   :  { %19 = vsyncpa [#allocation10], 0  ;;  %s3080_s15 = smov [#allocation6]   ;;  %s2986_s19 = scalar_lea.hbm %s3690_s2, 1024 }
   0x6   :  { %s39_s16 = sshll.u32 %s3080_s15, 4  ;;  %p2987_p0 = scmp.ne.s32.totalorder %s3690_s2, %s2986_s19  ;;  %s40_s16 = int_to_ptr.vmem [resolvable:$true] %s39_s16 }
   0x7   :  { %p2990_p1 = scmp.lt.u32.totalorder %s2986_s19, %s3690_s2 }
   0x9   :  { %p2992_p2 = pnand %p2990_p1, %p2987_p0 }
   0xb   :  { %2995 = shalt.err (!%p2992_p2)
}
   0xc   :  { %s2996_s9 = scalar_lea.vmem %s40_s16, 1024  ;;  %p3001_p4 = scmp.lt.s32.totalorder %s40_s16, %s40_s16 }
   0xd   :  { %p2997_p3 = scmp.ne.s32.totalorder %s40_s16, %s2996_s9  ;;  %p3002_p5 = scmp.lt.s32.totalorder %s2996_s9, %s2996_s9 }
   0xf   :  { %p3003_p6 = por %p3002_p5, %p3001_p4 }
  0x11   :  { %p3004_p7 = pnand %p3003_p6, %p2997_p3 }
  0x13   :  { %3007 = shalt.err (!%p3004_p7)
}
  0x14   :  { %s3081_s24 = smov 512   ;;  %s3082_s25 = smov 32  }
  0x15   :  { %45 = dma.hbm_to_vmem [thread:$0]  %s3690_s2, 1024, %s40_s16, [#allocation7], %s3081_s24, %s3081_s24, %s3082_s25  }
  0x16   :  { %s3083_s28 = smov [#allocation4]   ;;  %s3008_s12 = scalar_lea.hbm %s3688_s0, 1024 }
  0x17   :  { %s25_s29 = sshll.u32 %s3083_s28, 4  ;;  %p3009_p8 = scmp.ne.s32.totalorder %s3688_s0, %s3008_s12  ;;  %s26_s29 = int_to_ptr.vmem [resolvable:$true] %s25_s29 }
  0x18   :  { %p3012_p9 = scmp.lt.u32.totalorder %s3008_s12, %s3688_s0 }
  0x1a   :  { %p3014_p10 = pnand %p3012_p9, %p3009_p8 }
  0x1c   :  { %3017 = shalt.err (!%p3014_p10)
}
  0x1d   :  { %s3018_s18 = scalar_lea.vmem %s26_s29, 1024  ;;  %p3023_p12 = scmp.lt.s32.totalorder %s26_s29, %s26_s29 }
  0x1e   :  { %p3019_p11 = scmp.ne.s32.totalorder %s26_s29, %s3018_s18  ;;  %p3024_p13 = scmp.lt.s32.totalorder %s3018_s18, %s3018_s18 }
  0x20   :  { %p3025_p0 = por %p3024_p13, %p3023_p12 }
  0x22   :  { %p3026_p1 = pnand %p3025_p0, %p3019_p11 }
  0x24   :  { %3029 = shalt.err (!%p3026_p1)
}
  0x25   :  { %s3084_s2 = smov 128   ;;  %s3085_s16 = smov 8  }
  0x26   :  { %31 = dma.hbm_to_vmem [thread:$0]  %s3688_s0, 1024, %s26_s29, [#allocation5], %s3084_s2, %s3084_s2, %s3085_s16  }
  0x27   :  { %s3086_s21 = smov [#allocation8]   ;;  %s3087_s23 = smov [#allocation9]  }
  0x28   :  { %s51_s22 = sshll.u32 %s3086_s21, 4  ;;  %s65_s9 = sshll.u32 %s3087_s23, 4  ;;  %s52_s22 = int_to_ptr.vmem [resolvable:$true] %s51_s22  ;;  %s3180_s9 = int_to_ptr.vmem [resolvable:$true] %s65_s9 }
  0x29   :  { %s3030_s28 = scalar_lea.hbm %s3691_s3, 8192 }
  0x2a   :  { %p3031_p2 = scmp.ne.s32.totalorder %s3691_s3, %s3030_s28  ;;  %p3034_p3 = scmp.lt.u32.totalorder %s3030_s28, %s3691_s3 }
  0x2c   :  { %p3036_p4 = pnand %p3034_p3, %p3031_p2 }
  0x2e   :  { %3039 = shalt.err (!%p3036_p4)
}
  0x2f   :  { %s3040_s0 = scalar_lea.vmem %s52_s22, 8192  ;;  %p3045_p6 = scmp.lt.s32.totalorder %s52_s22, %s52_s22 }
  0x30   :  { %p3041_p5 = scmp.ne.s32.totalorder %s52_s22, %s3040_s0  ;;  %p3046_p7 = scmp.lt.s32.totalorder %s3040_s0, %s3040_s0 }
  0x32   :  { %p3047_p8 = por %p3046_p7, %p3045_p6 }
  0x34   :  { %p3048_p9 = pnand %p3047_p8, %p3041_p5 }
  0x36   :  { %3051 = shalt.err (!%p3048_p9)
}
  0x37   :  { %57 = dma.hbm_to_vmem [thread:$0]  %s3691_s3, 8192, %s52_s22, [#allocation7], %s3081_s24, %s3081_s24, %s3082_s25  }
  0x38   :  { %s3052_s18 = scalar_lea.hbm %s3693_s5, 2048 }
  0x39   :  { %p3053_p10 = scmp.ne.s32.totalorder %s3693_s5, %s3052_s18  ;;  %p3056_p11 = scmp.lt.u32.totalorder %s3052_s18, %s3693_s5 }
  0x3b   :  { %p3058_p12 = pnand %p3056_p11, %p3053_p10 }
  0x3d   :  { %3061 = shalt.err (!%p3058_p12)
}
  0x3e   :  { %s3062_s26 = scalar_lea.vmem %s3180_s9, 2048  ;;  %p3067_p0 = scmp.lt.s32.totalorder %s3180_s9, %s3180_s9 }
  0x3f   :  { %p3063_p13 = scmp.ne.s32.totalorder %s3180_s9, %s3062_s26  ;;  %p3068_p1 = scmp.lt.s32.totalorder %s3062_s26, %s3062_s26 }
  0x41   :  { %p3069_p2 = por %p3068_p1, %p3067_p0 }
  0x43   :  { %p3070_p3 = pnand %p3069_p2, %p3063_p13 }
  0x45   :  { %3073 = shalt.err (!%p3070_p3)
}
  0x46   :  { %71 = dma.hbm_to_vmem [thread:$0]  %s3693_s5, 2048, %s3180_s9, [#allocation10], %s3084_s2, %s3084_s2, %s3085_s16  }
  0x47   :  { %3074 = dma.done.wait [#allocation5], 1024  }
  0x48   :  { %3075 = vsyncadd [#allocation5], 4294966272 }
  0x49   :  { %3076 = dma.done.wait [#allocation7], 9216  }
  0x4a   :  { %3077 = vsyncadd [#allocation7], 4294958080 }
  0x4b   :  { %3078 = dma.done.wait [#allocation10], 2048  }
  0x4c   :  { %3079 = vsyncadd [#allocation10], 4294965248  ;;  %v3088_v1 = vmov 0.0   ;;  %vm155_vm0 = vcmask 1041408   ;;  %vm3089_vm1 = vmmov 1   ;;  %v101_v3 = vld [vmem:[#allocation6 + $0x8] sm:$0xff] }
  0x4d   :  { %232 = vmatprep.mubr.f32.mxu0 %v3088_v1  ;;  %345 = vmatprep.mubr.f32.mxu1 %v3088_v1  ;;  %vm3219_vm2 = vmpackc.low %vm155_vm0, %vm3089_vm1  ;;  %v105_v4 = vld [vmem:[#allocation6 + $0x28] sm:$0x3]  ;;  %v103_v5 = vld [vmem:[#allocation6 + $0x18] sm:$0xff]  ;;  %vm130_vm3 = vcmask 80896   ;;  %vm1928_vm4 = vcmask 1042432   ;;  %vm1924_vm5 = vcmask 23552  }
  0x4e   :  { %v2230_v6 = vpack.c.bf16 %v105_v4, %v101_v3  ;;  %v107_v7 = vld [vmem:[#allocation6 + $0x38] sm:$0x3]  ;;  %v100_v8 = vld [vmem:[#allocation6] sm:$0xff]  ;;  %v102_v12 = vld [vmem:[#allocation6 + $0x10] sm:$0xff]  ;;  %vm3091_vm6 = vmmov 0   ;;  %vm2105_vm7 = vcmask 7168  }
  0x4f   :  { %v104_v9 = vld [vmem:[#allocation6 + $0x20] sm:$0x3]  ;;  %v2236_v10 = vpack.c.bf16 %v107_v7, %v103_v5  ;;  %v106_v13 = vld [vmem:[#allocation6 + $0x30] sm:$0x3]  ;;  %v434_v16 = vld [vmem:[#allocation8 + $0x8] sm:$0xff] }
  0x50   :  { %v2233_v11 = vpack.c.bf16 %v104_v9, %v100_v8  ;;  %v92_v14 = vld [vmem:[#allocation4] sm:$0xff]  ;;  %2232 = vmatprep.subr.msk.bf16.mxu0 %vm3219_vm2, %v2230_v6  ;;  %v2239_v15 = vpack.c.bf16 %v106_v13, %v102_v12  ;;  %v438_v17 = vld [vmem:[#allocation8 + $0x28] sm:$0xff]  ;;  %v436_v18 = vld [vmem:[#allocation8 + $0x18] sm:$0xff] }
  0x51   :  { %2238 = vmatprep.subr.msk.bf16.mxu1 %vm3219_vm2, %v2236_v10  ;;  %v3229_v19 = vpack.c.bf16 %v438_v17, %v434_v16  ;;  %v440_v20 = vld [vmem:[#allocation8 + $0x38] sm:$0xff]  ;;  %v433_v21 = vld [vmem:[#allocation8] sm:$0xff]  ;;  %v435_v25 = vld [vmem:[#allocation8 + $0x10] sm:$0xff] }
  0x52   :  { %2235 = vmatpush1.bf16.msk.msra.mxu0 %vm3219_vm2, %v2233_v11  ;;  %v437_v22 = vld [vmem:[#allocation8 + $0x20] sm:$0xff]  ;;  %2241 = vmatpush1.bf16.msk.msra.mxu1 %vm3219_vm2, %v2239_v15  ;;  %v3233_v23 = vpack.c.bf16 %v440_v20, %v436_v18  ;;  %v439_v26 = vld [vmem:[#allocation8 + $0x30] sm:$0xff]  ;;  %v442_v28 = vld [vmem:[#allocation8 + $0x48] sm:$0xff] }
  0x53   :  { %v3235_v24 = vpack.c.bf16 %v437_v22, %v433_v21  ;;  %2243 = vmatprep.subr.bf16.mxu0 %v3229_v19  ;;  %v3238_v27 = vpack.c.bf16 %v439_v26, %v435_v25  ;;  %v446_v29 = vld [vmem:[#allocation8 + $0x68] sm:$0xff]  ;;  %v444_v30 = vld [vmem:[#allocation8 + $0x58] sm:$0xff]  ;;  %v441_v33 = vld [vmem:[#allocation8 + $0x40] sm:$0xff] }
  0x54   :  { %2275 = vmatprep.subr.bf16.mxu1 %v3233_v23  ;;  %v3242_v31 = vpack.c.bf16 %v446_v29, %v442_v28  ;;  %v448_v32 = vld [vmem:[#allocation8 + $0x78] sm:$0xff]  ;;  %v445_v34 = vld [vmem:[#allocation8 + $0x60] sm:$0xff]  ;;  %v93_v35 = vld [vmem:[#allocation4 + $0x8] sm:$0xff] }
  0x55   :  { %2123 = vmatmul.mubr.msk.f32.vlgmr.msra.gmra.mrb[0].mxu0 %vm130_vm3, %v92_v14  ;;  %2133 = vmatmul.mubr.msk.f32.vlgmr.msra.gmra.mrb[0].mxu1 %vm130_vm3, %v92_v14  ;;  %v3246_v36 = vpack.c.bf16 %v448_v32, %v444_v30  ;;  %v3248_v37 = vpack.c.bf16 %v445_v34, %v441_v33  ;;  %v443_v38 = vld [vmem:[#allocation8 + $0x50] sm:$0xff]  ;;  %v450_v41 = vld [vmem:[#allocation8 + $0x88] sm:$0xff]  ;;  %v452_v43 = vld [vmem:[#allocation8 + $0x98] sm:$0xff] }
  0x56   :  { %2245 = vmatpush1.bf16.msra.mxu0 %v3235_v24  ;;  %v447_v39 = vld [vmem:[#allocation8 + $0x70] sm:$0xff]  ;;  %2277 = vmatpush1.bf16.msra.mxu1 %v3238_v27  ;;  %v454_v42 = vld [vmem:[#allocation8 + $0xa8] sm:$0xff]  ;;  %v456_v45 = vld [vmem:[#allocation8 + $0xb8] sm:$0xff] }
  0x57   :  { %238 = vmatprep.mubr.f32.mxu0 %v3088_v1  ;;  %v3252_v40 = vpack.c.bf16 %v447_v39, %v443_v38  ;;  %351 = vmatprep.mubr.f32.mxu1 %v3088_v1  ;;  %v3256_v44 = vpack.c.bf16 %v454_v42, %v450_v41  ;;  %v449_v46 = vld [vmem:[#allocation8 + $0x80] sm:$0xff]  ;;  %v94_v48 = vld [vmem:[#allocation4 + $0x10] sm:$0xff]  ;;  %v3260_v49 = vpack.c.bf16 %v456_v45, %v452_v43  ;;  %v458_v53 = vld [vmem:[#allocation8 + $0xc8] sm:$0xff] }
  0x58   :  { %2247 = vmatprep.subr.bf16.mxu0 %v3242_v31  ;;  %v453_v47 = vld [vmem:[#allocation8 + $0xa0] sm:$0xff]  ;;  %2279 = vmatprep.subr.bf16.mxu1 %v3246_v36  ;;  %v451_v50 = vld [vmem:[#allocation8 + $0x90] sm:$0xff]  ;;  %v462_v54 = vld [vmem:[#allocation8 + $0xe8] sm:$0xff] }
  0x59   :  { %2124 = vmatmul.mubr.msk.f32.gmra.mrb[2].mxu0 %vm130_vm3, %v93_v35  ;;  %v455_v51 = vld [vmem:[#allocation8 + $0xb0] sm:$0xff]  ;;  %2134 = vmatmul.mubr.msk.f32.gmra.mrb[2].mxu1 %vm130_vm3, %v93_v35  ;;  %v3264_v52 = vpack.c.bf16 %v453_v47, %v449_v46  ;;  %v460_v55 = vld [vmem:[#allocation8 + $0xd8] sm:$0xff]  ;;  %v457_v58 = vld [vmem:[#allocation8 + $0xc0] sm:$0xff]  ;;  %v3272_v60 = vpack.c.bf16 %v462_v54, %v458_v53 }
  0x5a   :  { %2249 = vmatpush1.bf16.msra.mxu0 %v3248_v37  ;;  %2281 = vmatpush1.bf16.msra.mxu1 %v3252_v40  ;;  %v3268_v56 = vpack.c.bf16 %v455_v51, %v451_v50  ;;  %v464_v57 = vld [vmem:[#allocation8 + $0xf8] sm:$0xff]  ;;  %v461_v59 = vld [vmem:[#allocation8 + $0xe0] sm:$0xff]  ;;  %v459_v61 = vld [vmem:[#allocation8 + $0xd0] sm:$0xff] }
  0x5b   :  { %244 = vmatprep.mubr.f32.mxu0 %v3088_v1  ;;  %357 = vmatprep.mubr.f32.mxu1 %v3088_v1  ;;  %v463_v62 = vld [vmem:[#allocation8 + $0xf0] sm:$0xff]  ;;  %v3276_v63 = vpack.c.bf16 %v464_v57, %v460_v55  ;;  %v466_v0 = vld [vmem:[#allocation8 + $0x108] sm:$0xff]  ;;  %v95_v3 = vld [vmem:[#allocation4 + $0x18] sm:$0xff]  ;;  %v3280_v4 = vpack.c.bf16 %v461_v59, %v457_v58 }
  0x5c   :  { %2251 = vmatprep.subr.bf16.mxu0 %v3256_v44  ;;  %2283 = vmatprep.subr.bf16.mxu1 %v3260_v49  ;;  %v470_v2 = vld [vmem:[#allocation8 + $0x128] sm:$0xff]  ;;  %v468_v5 = vld [vmem:[#allocation8 + $0x118] sm:$0xff]  ;;  %v3284_v7 = vpack.c.bf16 %v463_v62, %v459_v61  ;;  %v465_v8 = vld [vmem:[#allocation8 + $0x100] sm:$0xff] }
  0x5d   :  { %2125 = vmatmul.mubr.msk.f32.gmra.mrb[4].mxu0 %vm130_vm3, %v94_v48  ;;  %2135 = vmatmul.mubr.msk.f32.gmra.mrb[4].mxu1 %vm130_vm3, %v94_v48  ;;  %v472_v6 = vld [vmem:[#allocation8 + $0x138] sm:$0xff]  ;;  %v469_v9 = vld [vmem:[#allocation8 + $0x120] sm:$0xff]  ;;  %v3288_v10 = vpack.c.bf16 %v470_v2, %v466_v0  ;;  %v467_v11 = vld [vmem:[#allocation8 + $0x110] sm:$0xff] }
  0x5e   :  { %2253 = vmatpush1.bf16.msra.mxu0 %v3264_v52  ;;  %2285 = vmatpush1.bf16.msra.mxu1 %v3268_v56  ;;  %v471_v12 = vld [vmem:[#allocation8 + $0x130] sm:$0xff]  ;;  %v3292_v13 = vpack.c.bf16 %v472_v6, %v468_v5  ;;  %v474_v14 = vld [vmem:[#allocation8 + $0x148] sm:$0xff]  ;;  %v96_v16 = vld [vmem:[#allocation4 + $0x20] sm:$0xff]  ;;  %v3296_v17 = vpack.c.bf16 %v469_v9, %v465_v8  ;;  %v110_v9 = vlaneseq }
  0x5f   :  { %250 = vmatprep.mubr.f32.mxu0 %v3088_v1  ;;  %363 = vmatprep.mubr.f32.mxu1 %v3088_v1  ;;  %v478_v15 = vld [vmem:[#allocation8 + $0x168] sm:$0xff]  ;;  %v476_v18 = vld [vmem:[#allocation8 + $0x158] sm:$0xff]  ;;  %v3300_v21 = vpack.c.bf16 %v471_v12, %v467_v11  ;;  %v473_v22 = vld [vmem:[#allocation8 + $0x140] sm:$0xff] }
  0x60   :  { %2255 = vmatprep.subr.bf16.mxu0 %v3272_v60  ;;  %2287 = vmatprep.subr.bf16.mxu1 %v3276_v63  ;;  %v480_v20 = vld [vmem:[#allocation8 + $0x178] sm:$0xff]  ;;  %v477_v25 = vld [vmem:[#allocation8 + $0x160] sm:$0xff]  ;;  %v3304_v26 = vpack.c.bf16 %v478_v15, %v474_v14  ;;  %v475_v28 = vld [vmem:[#allocation8 + $0x150] sm:$0xff]  ;;  %v111_v11 = vshrl.u32 %v110_v9, 7 }
  0x61   :  { %2126 = vmatmul.mubr.msk.f32.gmra.mrb[6].mxu0 %vm130_vm3, %v95_v3  ;;  %2136 = vmatmul.mubr.msk.f32.gmra.mrb[6].mxu1 %vm130_vm3, %v95_v3  ;;  %v479_v29 = vld [vmem:[#allocation8 + $0x170] sm:$0xff]  ;;  %v3308_v30 = vpack.c.bf16 %v480_v20, %v476_v18  ;;  %v482_v32 = vld [vmem:[#allocation8 + $0x188] sm:$0xff]  ;;  %v3312_v35 = vpack.c.bf16 %v477_v25, %v473_v22  ;;  %v484_v38 = vld [vmem:[#allocation8 + $0x198] sm:$0xff] }
  0x62   :  { %2257 = vmatpush1.bf16.msra.mxu0 %v3280_v4  ;;  %2289 = vmatpush1.bf16.msra.mxu1 %v3284_v7  ;;  %v486_v33 = vld [vmem:[#allocation8 + $0x1a8] sm:$0xff]  ;;  %v488_v39 = vld [vmem:[#allocation8 + $0x1b8] sm:$0xff]  ;;  %v3316_v41 = vpack.c.bf16 %v479_v29, %v475_v28  ;;  %v481_v42 = vld [vmem:[#allocation8 + $0x180] sm:$0xff]  ;;  %v112_v12 = vsub.s32 0, %v111_v11  ;;  %v116_v15 = vsub.s32 1, %v111_v11  ;;  %v124_v22 = vsub.s32 3, %v111_v11 }
  0x63   :  { %256 = vmatprep.mubr.f32.mxu0 %v3088_v1  ;;  %369 = vmatprep.mubr.f32.mxu1 %v3088_v1  ;;  %v97_v34 = vld [vmem:[#allocation4 + $0x28] sm:$0xff]  ;;  %v485_v43 = vld [vmem:[#allocation8 + $0x1a0] sm:$0xff]  ;;  %v3320_v45 = vpack.c.bf16 %v486_v33, %v482_v32  ;;  %v483_v46 = vld [vmem:[#allocation8 + $0x190] sm:$0xff]  ;;  %v3324_v48 = vpack.c.bf16 %v488_v39, %v484_v38 }
  0x64   :  { %2259 = vmatprep.subr.bf16.mxu0 %v3288_v10  ;;  %2291 = vmatprep.subr.bf16.mxu1 %v3292_v13  ;;  %v487_v47 = vld [vmem:[#allocation8 + $0x1b0] sm:$0xff]  ;;  %v490_v50 = vld [vmem:[#allocation8 + $0x1c8] sm:$0xff]  ;;  %v3328_v54 = vpack.c.bf16 %v485_v43, %v481_v42  ;;  %v492_v55 = vld [vmem:[#allocation8 + $0x1d8] sm:$0xff]  ;;  %v120_v42 = vsub.s32 2, %v111_v11 }
  0x65   :  { %2127 = vmatmul.mubr.msk.f32.gmra.mrb[8].mxu0 %vm130_vm3, %v96_v16  ;;  %2137 = vmatmul.mubr.msk.f32.gmra.mrb[8].mxu1 %vm130_vm3, %v96_v16  ;;  %v494_v51 = vld [vmem:[#allocation8 + $0x1e8] sm:$0xff]  ;;  %v98_v53 = vld [vmem:[#allocation4 + $0x30] sm:$0xff]  ;;  %v496_v57 = vld [vmem:[#allocation8 + $0x1f8] sm:$0xff]  ;;  %v3332_v58 = vpack.c.bf16 %v487_v47, %v483_v46 }
  0x66   :  { %2261 = vmatpush1.bf16.msra.mxu0 %v3296_v17  ;;  %2293 = vmatpush1.bf16.msra.mxu1 %v3300_v21  ;;  %v489_v59 = vld [vmem:[#allocation8 + $0x1c0] sm:$0xff]  ;;  %v3336_v62 = vpack.c.bf16 %v494_v51, %v490_v50  ;;  %v491_v0 = vld [vmem:[#allocation8 + $0x1d0] sm:$0xff]  ;;  %v3340_v3 = vpack.c.bf16 %v496_v57, %v492_v55  ;;  %v99_v5 = vld [vmem:[#allocation4 + $0x38] sm:$0xff] }
  0x67   :  { %262 = vmatprep.mubr.f32.mxu0 %v3088_v1  ;;  %375 = vmatprep.mubr.f32.mxu1 %v3088_v1  ;;  %v493_v61 = vld [vmem:[#allocation8 + $0x1e0] sm:$0xff]  ;;  %v495_v2 = vld [vmem:[#allocation8 + $0x1f0] sm:$0xff] }
  0x68   :  { %2263 = vmatprep.subr.bf16.mxu0 %v3304_v26  ;;  %2295 = vmatprep.subr.bf16.mxu1 %v3308_v30  ;;  %v3344_v6 = vpack.c.bf16 %v493_v61, %v489_v59  ;;  %v3348_v8 = vpack.c.bf16 %v495_v2, %v491_v0  ;;  %v108_v14 = vld [vmem:[%s3692_s4] sm:$0xf] }
  0x69   :  { %2128 = vmatmul.mubr.msk.f32.gmra.mrb[10].mxu0 %vm130_vm3, %v97_v34  ;;  %2138 = vmatmul.mubr.msk.f32.gmra.mrb[10].mxu1 %vm130_vm3, %v97_v34  ;;  %v3400_v16 = vrot.slane %v108_v14, %v112_v12  ;;  %v3402_v18 = vrot.slane %v108_v14, %v116_v15  ;;  %v3406_v39 = vrot.slane %v108_v14, %v124_v22 }
  0x6a   :  { %2265 = vmatpush1.bf16.msra.mxu0 %v3312_v35  ;;  %2297 = vmatpush1.bf16.msra.mxu1 %v3316_v41  ;;  %v3409_v46 = vrot.slane %v108_v14, %v120_v42 }
  0x6b   :  { %268 = vmatprep.mubr.f32.mxu0 %v3088_v1  ;;  %381 = vmatprep.mubr.f32.mxu1 %v3088_v1 }
  0x6c   :  { %2267 = vmatprep.subr.bf16.mxu0 %v3320_v45  ;;  %2299 = vmatprep.subr.bf16.mxu1 %v3324_v48 }
  0x6d   :  { %2129 = vmatmul.mubr.msk.f32.gmra.mrb[12].mxu0 %vm130_vm3, %v98_v53  ;;  %2139 = vmatmul.mubr.msk.f32.gmra.mrb[12].mxu1 %vm130_vm3, %v98_v53 }
  0x6e   :  { %2269 = vmatpush1.bf16.msra.mxu0 %v3328_v54  ;;  %2301 = vmatpush1.bf16.msra.mxu1 %v3332_v58 }
  0x6f   :  { %274 = vmatprep.mubr.f32.mxu0 %v3088_v1  ;;  %387 = vmatprep.mubr.f32.mxu1 %v3088_v1 }
  0x70   :  { %2271 = vmatprep.subr.bf16.mxu0 %v3336_v62  ;;  %2303 = vmatprep.subr.bf16.mxu1 %v3340_v3 }
  0x71   :  { %2130 = vmatmul.mubr.msk.f32.gmra.mrb[14].mxu0 %vm130_vm3, %v99_v5  ;;  %2140 = vmatmul.mubr.msk.f32.gmra.mrb[14].mxu1 %vm130_vm3, %v99_v5 }
  0x72   :  { %2273 = vmatpush1.bf16.msra.mxu0 %v3344_v6  ;;  %2305 = vmatpush1.bf16.msra.mxu1 %v3348_v8 }
  0x73   :  { %561 = vmatprep.mubr.f32.mxu0 %v3088_v1  ;;  %632 = vmatprep.mubr.f32.mxu1 %v3088_v1 }
  0x74   :  { %2307 = vmatprep.subr.bf16.mxu0 %v3229_v19  ;;  %2339 = vmatprep.subr.bf16.mxu1 %v3233_v23 }
  0x75   :  { %562 = vmatmul.mubr.f32.vlgmr.msra.gmra.mrb[0].mxu0 %v3088_v1  ;;  %633 = vmatmul.mubr.f32.vlgmr.msra.gmra.mrb[0].mxu1 %v3088_v1 }
  0x76   :  { %2309 = vmatpush1.bf16.msra.mxu0 %v3235_v24  ;;  %2341 = vmatpush1.bf16.msra.mxu1 %v3238_v27 }
  0x77   :  { %2311 = vmatprep.subr.bf16.mxu0 %v3242_v31  ;;  %2343 = vmatprep.subr.bf16.mxu1 %v3246_v36 }
  0x78   :  { %738 = vmatprep.mubr.f32.mxu0 %v3088_v1  ;;  %809 = vmatprep.mubr.f32.mxu1 %v3088_v1 }
  0x7a   :  { %2313 = vmatpush1.bf16.msra.mxu0 %v3248_v37  ;;  %2345 = vmatpush1.bf16.msra.mxu1 %v3252_v40 }
  0x7b   :  { %2315 = vmatprep.subr.bf16.mxu0 %v3256_v44  ;;  %2347 = vmatprep.subr.bf16.mxu1 %v3260_v49 }
  0x7e   :  { %2317 = vmatpush1.bf16.msra.mxu0 %v3264_v52  ;;  %2349 = vmatpush1.bf16.msra.mxu1 %v3268_v56 }
  0x7f   :  { %2319 = vmatprep.subr.bf16.mxu0 %v3272_v60  ;;  %2351 = vmatprep.subr.bf16.mxu1 %v3276_v63 }
  0x82   :  { %2321 = vmatpush1.bf16.msra.mxu0 %v3280_v4  ;;  %2353 = vmatpush1.bf16.msra.mxu1 %v3284_v7 }
  0x83   :  { %2323 = vmatprep.subr.bf16.mxu0 %v3288_v10  ;;  %2355 = vmatprep.subr.bf16.mxu1 %v3292_v13 }
  0x86   :  { %2325 = vmatpush1.bf16.msra.mxu0 %v3296_v17  ;;  %2357 = vmatpush1.bf16.msra.mxu1 %v3300_v21 }
  0x87   :  { %2327 = vmatprep.subr.bf16.mxu0 %v3304_v26  ;;  %2359 = vmatprep.subr.bf16.mxu1 %v3308_v30 }
  0x8a   :  { %2329 = vmatpush1.bf16.msra.mxu0 %v3312_v35  ;;  %2361 = vmatpush1.bf16.msra.mxu1 %v3316_v41 }
  0x8b   :  { %2331 = vmatprep.subr.bf16.mxu0 %v3320_v45  ;;  %2363 = vmatprep.subr.bf16.mxu1 %v3324_v48 }
  0x8e   :  { %2333 = vmatpush1.bf16.msra.mxu0 %v3328_v54  ;;  %2365 = vmatpush1.bf16.msra.mxu1 %v3332_v58 }
  0x8f   :  { %2335 = vmatprep.subr.bf16.mxu0 %v3336_v62  ;;  %2367 = vmatprep.subr.bf16.mxu1 %v3340_v3 }
  0x92   :  { %2337 = vmatpush1.bf16.msra.mxu0 %v3344_v6  ;;  %2369 = vmatpush1.bf16.msra.mxu1 %v3348_v8 }
  0x93   :  { %2371 = vmatprep.subr.bf16.mxu0 %v3229_v19  ;;  %2403 = vmatprep.subr.bf16.mxu1 %v3233_v23 }
 0x148   :  { %v563_v20 = vpop.f32.mrb[0].mxu0  ;;  %v634_v28 = vpop.f32.mrb[0].mxu1 }
 0x149   :  { %v2778_v25 = vadd.f32 %v563_v20, %v3400_v16  ;;  %v565_v29 = vpop.f32.mrb[1].mxu0  ;;  %v636_v33 = vpop.f32.mrb[1].mxu1  ;;  %v2794_v50 = vadd.f32 %v634_v28, %v3409_v46 }
 0x14a   :  { %v2779_v32 = vadd.f32 %v565_v29, %v3402_v18  ;;  %v2795_v43 = vadd.f32 %v636_v33, %v3406_v39 }
 0x14b   :  { %v2141_v34 = vmul.f32 -1.442695, %v2778_v25 }
 0x14c   :  { %v2142_v38 = vmul.f32 -1.442695, %v2779_v32  ;;  %v2143_v47 = vmul.f32 -1.442695, %v2795_v43 }
 0x14d   :  { %2854 = vpow2.f32 %v2141_v34 }
 0x14e   :  { %2856 = vpow2.f32 %v2142_v38 }
 0x14f   :  { %2858 = vpow2.f32 %v2143_v47 }
 0x150   :  { %2860 = vtanh.f32 %v2794_v50 }
 0x157   :  { %v2855_v51 = vpop.eup %2854 }
 0x158   :  { %v2857_v53 = vpop.eup %2856  ;;  %v646_v55 = vadd.f32 1.0, %v2855_v51 }
 0x159   :  { %v652_v57 = vadd.f32 1.0, %v2857_v53  ;;  %v2859_v59 = vpop.eup %2858 }
 0x15a   :  { %2862 = vrcp.f32 %v646_v55  ;;  %v2861_v61 = vpop.eup %2860  ;;  %v659_v9 = vadd.f32 1.0, %v2859_v59 }
 0x15b   :  { %2864 = vrcp.f32 %v652_v57 }
 0x15c   :  { %2866 = vrcp.f32 %v659_v9 }
 0x164   :  { %v2863_v0 = vpop.eup %2862 }
 0x165   :  { %v2865_v2 = vpop.eup %2864  ;;  %v663_v5 = vmul.f32 %v2863_v0, %v2861_v61 }
 0x166   :  { %v662_v11 = vmul.f32 0.0, %v2865_v2  ;;  %v2867_v14 = vpop.eup %2866 }
 0x168   :  { %v3412_v12 = vadd.f32 %v663_v5, %v662_v11 }
 0x16a   :  { %2868 = vtanh.f32 %v3412_v12 }
 0x174   :  { %v2869_v15 = vpop.eup %2868 }
 0x175   :  { %v666_v20 = vmul.f32 %v2869_v15, %v2867_v14 }
 0x177   :  { %739 = vmatmul.mubr.f32.vlgmr.msra.gmra.mrb[2].mxu0 %v666_v20  ;;  %810 = vmatmul.mubr.f32.vlgmr.msra.gmra.mrb[2].mxu1 %v666_v20 }
 0x178   :  { %2373 = vmatpush1.bf16.msra.mxu0 %v3235_v24  ;;  %2405 = vmatpush1.bf16.msra.mxu1 %v3238_v27 }
 0x179   :  { %2375 = vmatprep.subr.bf16.mxu0 %v3242_v31  ;;  %2407 = vmatprep.subr.bf16.mxu1 %v3246_v36 }
 0x17a   :  { %915 = vmatprep.mubr.f32.mxu0 %v3088_v1  ;;  %986 = vmatprep.mubr.f32.mxu1 %v3088_v1 }
 0x17c   :  { %2377 = vmatpush1.bf16.msra.mxu0 %v3248_v37  ;;  %2409 = vmatpush1.bf16.msra.mxu1 %v3252_v40 }
 0x17d   :  { %2379 = vmatprep.subr.bf16.mxu0 %v3256_v44  ;;  %2411 = vmatprep.subr.bf16.mxu1 %v3260_v49 }
 0x180   :  { %2381 = vmatpush1.bf16.msra.mxu0 %v3264_v52  ;;  %2413 = vmatpush1.bf16.msra.mxu1 %v3268_v56 }
 0x181   :  { %2383 = vmatprep.subr.bf16.mxu0 %v3272_v60  ;;  %2415 = vmatprep.subr.bf16.mxu1 %v3276_v63 }
 0x184   :  { %2385 = vmatpush1.bf16.msra.mxu0 %v3280_v4  ;;  %2417 = vmatpush1.bf16.msra.mxu1 %v3284_v7 }
 0x185   :  { %2387 = vmatprep.subr.bf16.mxu0 %v3288_v10  ;;  %2419 = vmatprep.subr.bf16.mxu1 %v3292_v13 }
 0x188   :  { %2389 = vmatpush1.bf16.msra.mxu0 %v3296_v17  ;;  %2421 = vmatpush1.bf16.msra.mxu1 %v3300_v21 }
 0x189   :  { %2391 = vmatprep.subr.bf16.mxu0 %v3304_v26  ;;  %2423 = vmatprep.subr.bf16.mxu1 %v3308_v30 }
 0x18c   :  { %2393 = vmatpush1.bf16.msra.mxu0 %v3312_v35  ;;  %2425 = vmatpush1.bf16.msra.mxu1 %v3316_v41 }
 0x18d   :  { %2395 = vmatprep.subr.bf16.mxu0 %v3320_v45  ;;  %2427 = vmatprep.subr.bf16.mxu1 %v3324_v48 }
 0x190   :  { %2397 = vmatpush1.bf16.msra.mxu0 %v3328_v54  ;;  %2429 = vmatpush1.bf16.msra.mxu1 %v3332_v58 }
 0x191   :  { %2399 = vmatprep.subr.bf16.mxu0 %v3336_v62  ;;  %2431 = vmatprep.subr.bf16.mxu1 %v3340_v3 }
 0x194   :  { %2401 = vmatpush1.bf16.msra.mxu0 %v3344_v6  ;;  %2433 = vmatpush1.bf16.msra.mxu1 %v3348_v8 }
 0x195   :  { %2435 = vmatprep.subr.bf16.mxu0 %v3229_v19  ;;  %2467 = vmatprep.subr.bf16.mxu1 %v3233_v23 }
 0x24a   :  { %v740_v22 = vpop.f32.mrb[2].mxu0  ;;  %v811_v25 = vpop.f32.mrb[2].mxu1 }
 0x24b   :  { %v2780_v28 = vadd.f32 %v740_v22, %v3400_v16  ;;  %v742_v29 = vpop.f32.mrb[3].mxu0  ;;  %v813_v32 = vpop.f32.mrb[3].mxu1  ;;  %v2796_v47 = vadd.f32 %v811_v25, %v3409_v46 }
 0x24c   :  { %v2781_v33 = vadd.f32 %v742_v29, %v3402_v18  ;;  %v2797_v42 = vadd.f32 %v813_v32, %v3406_v39 }
 0x24d   :  { %v2144_v34 = vmul.f32 -1.442695, %v2780_v28 }
 0x24e   :  { %v2145_v38 = vmul.f32 -1.442695, %v2781_v33  ;;  %v2146_v43 = vmul.f32 -1.442695, %v2797_v42 }
 0x24f   :  { %2870 = vpow2.f32 %v2144_v34 }
 0x250   :  { %2872 = vpow2.f32 %v2145_v38 }
 0x251   :  { %2874 = vpow2.f32 %v2146_v43 }
 0x252   :  { %2876 = vtanh.f32 %v2796_v47 }
 0x259   :  { %v2871_v50 = vpop.eup %2870 }
 0x25a   :  { %v2873_v51 = vpop.eup %2872  ;;  %v823_v53 = vadd.f32 1.0, %v2871_v50 }
 0x25b   :  { %v829_v55 = vadd.f32 1.0, %v2873_v51  ;;  %v2875_v57 = vpop.eup %2874 }
 0x25c   :  { %2878 = vrcp.f32 %v823_v53  ;;  %v2877_v59 = vpop.eup %2876  ;;  %v836_v5 = vadd.f32 1.0, %v2875_v57 }
 0x25d   :  { %2880 = vrcp.f32 %v829_v55 }
 0x25e   :  { %2882 = vrcp.f32 %v836_v5 }
 0x266   :  { %v2879_v61 = vpop.eup %2878 }
 0x267   :  { %v2881_v0 = vpop.eup %2880  ;;  %v840_v2 = vmul.f32 %v2879_v61, %v2877_v59 }
 0x268   :  { %v839_v9 = vmul.f32 %v2881_v0, %v3412_v12  ;;  %v2883_v14 = vpop.eup %2882 }
 0x26a   :  { %v3454_v11 = vadd.f32 %v840_v2, %v839_v9 }
 0x26c   :  { %2884 = vtanh.f32 %v3454_v11 }
 0x276   :  { %v2885_v15 = vpop.eup %2884 }
 0x277   :  { %v843_v20 = vmul.f32 %v2885_v15, %v2883_v14 }
 0x279   :  { %916 = vmatmul.mubr.f32.vlgmr.msra.gmra.mrb[4].mxu0 %v843_v20  ;;  %987 = vmatmul.mubr.f32.vlgmr.msra.gmra.mrb[4].mxu1 %v843_v20 }
 0x27a   :  { %2437 = vmatpush1.bf16.msra.mxu0 %v3235_v24  ;;  %2469 = vmatpush1.bf16.msra.mxu1 %v3238_v27 }
 0x27b   :  { %2439 = vmatprep.subr.bf16.mxu0 %v3242_v31  ;;  %2471 = vmatprep.subr.bf16.mxu1 %v3246_v36 }
 0x27c   :  { %1092 = vmatprep.mubr.f32.mxu0 %v3088_v1  ;;  %1163 = vmatprep.mubr.f32.mxu1 %v3088_v1 }
 0x27e   :  { %2441 = vmatpush1.bf16.msra.mxu0 %v3248_v37  ;;  %2473 = vmatpush1.bf16.msra.mxu1 %v3252_v40 }
 0x27f   :  { %2443 = vmatprep.subr.bf16.mxu0 %v3256_v44  ;;  %2475 = vmatprep.subr.bf16.mxu1 %v3260_v49 }
 0x282   :  { %2445 = vmatpush1.bf16.msra.mxu0 %v3264_v52  ;;  %2477 = vmatpush1.bf16.msra.mxu1 %v3268_v56 }
 0x283   :  { %2447 = vmatprep.subr.bf16.mxu0 %v3272_v60  ;;  %2479 = vmatprep.subr.bf16.mxu1 %v3276_v63 }
 0x286   :  { %2449 = vmatpush1.bf16.msra.mxu0 %v3280_v4  ;;  %2481 = vmatpush1.bf16.msra.mxu1 %v3284_v7 }
 0x287   :  { %2451 = vmatprep.subr.bf16.mxu0 %v3288_v10  ;;  %2483 = vmatprep.subr.bf16.mxu1 %v3292_v13 }
 0x28a   :  { %2453 = vmatpush1.bf16.msra.mxu0 %v3296_v17  ;;  %2485 = vmatpush1.bf16.msra.mxu1 %v3300_v21 }
 0x28b   :  { %2455 = vmatprep.subr.bf16.mxu0 %v3304_v26  ;;  %2487 = vmatprep.subr.bf16.mxu1 %v3308_v30 }
 0x28e   :  { %2457 = vmatpush1.bf16.msra.mxu0 %v3312_v35  ;;  %2489 = vmatpush1.bf16.msra.mxu1 %v3316_v41 }
 0x28f   :  { %2459 = vmatprep.subr.bf16.mxu0 %v3320_v45  ;;  %2491 = vmatprep.subr.bf16.mxu1 %v3324_v48 }
 0x292   :  { %2461 = vmatpush1.bf16.msra.mxu0 %v3328_v54  ;;  %2493 = vmatpush1.bf16.msra.mxu1 %v3332_v58 }
 0x293   :  { %2463 = vmatprep.subr.bf16.mxu0 %v3336_v62  ;;  %2495 = vmatprep.subr.bf16.mxu1 %v3340_v3 }
 0x296   :  { %2465 = vmatpush1.bf16.msra.mxu0 %v3344_v6  ;;  %2497 = vmatpush1.bf16.msra.mxu1 %v3348_v8 }
 0x297   :  { %2499 = vmatprep.subr.bf16.mxu0 %v3229_v19  ;;  %2531 = vmatprep.subr.bf16.mxu1 %v3233_v23 }
 0x34c   :  { %v917_v12 = vpop.f32.mrb[4].mxu0  ;;  %v988_v22 = vpop.f32.mrb[4].mxu1 }
 0x34d   :  { %v2782_v25 = vadd.f32 %v917_v12, %v3400_v16  ;;  %v919_v28 = vpop.f32.mrb[5].mxu0  ;;  %v990_v29 = vpop.f32.mrb[5].mxu1  ;;  %v2798_v43 = vadd.f32 %v988_v22, %v3409_v46 }
 0x34e   :  { %v2783_v32 = vadd.f32 %v919_v28, %v3402_v18  ;;  %v2799_v38 = vadd.f32 %v990_v29, %v3406_v39 }
 0x34f   :  { %v2147_v33 = vmul.f32 -1.442695, %v2782_v25 }
 0x350   :  { %v2148_v34 = vmul.f32 -1.442695, %v2783_v32  ;;  %v2149_v42 = vmul.f32 -1.442695, %v2799_v38 }
 0x351   :  { %2886 = vpow2.f32 %v2147_v33 }
 0x352   :  { %2888 = vpow2.f32 %v2148_v34 }
 0x353   :  { %2890 = vpow2.f32 %v2149_v42 }
 0x354   :  { %2892 = vtanh.f32 %v2798_v43 }
 0x35b   :  { %v2887_v47 = vpop.eup %2886 }
 0x35c   :  { %v2889_v50 = vpop.eup %2888  ;;  %v1000_v51 = vadd.f32 1.0, %v2887_v47 }
 0x35d   :  { %v1006_v53 = vadd.f32 1.0, %v2889_v50  ;;  %v2891_v55 = vpop.eup %2890 }
 0x35e   :  { %2894 = vrcp.f32 %v1000_v51  ;;  %v2893_v57 = vpop.eup %2892  ;;  %v1013_v2 = vadd.f32 1.0, %v2891_v55 }
 0x35f   :  { %2896 = vrcp.f32 %v1006_v53 }
 0x360   :  { %2898 = vrcp.f32 %v1013_v2 }
 0x368   :  { %v2895_v59 = vpop.eup %2894 }
 0x369   :  { %v2897_v61 = vpop.eup %2896  ;;  %v1017_v0 = vmul.f32 %v2895_v59, %v2893_v57 }
 0x36a   :  { %v1016_v5 = vmul.f32 %v2897_v61, %v3454_v11  ;;  %v2899_v14 = vpop.eup %2898 }
 0x36c   :  { %v3496_v9 = vadd.f32 %v1017_v0, %v1016_v5 }
 0x36e   :  { %2900 = vtanh.f32 %v3496_v9 }
 0x378   :  { %v2901_v15 = vpop.eup %2900 }
 0x379   :  { %v1020_v20 = vmul.f32 %v2901_v15, %v2899_v14 }
 0x37b   :  { %1093 = vmatmul.mubr.f32.vlgmr.msra.gmra.mrb[6].mxu0 %v1020_v20  ;;  %1164 = vmatmul.mubr.f32.vlgmr.msra.gmra.mrb[6].mxu1 %v1020_v20 }
 0x37c   :  { %2501 = vmatpush1.bf16.msra.mxu0 %v3235_v24  ;;  %2533 = vmatpush1.bf16.msra.mxu1 %v3238_v27 }
 0x37d   :  { %2503 = vmatprep.subr.bf16.mxu0 %v3242_v31  ;;  %2535 = vmatprep.subr.bf16.mxu1 %v3246_v36 }
 0x37e   :  { %1269 = vmatprep.mubr.f32.mxu0 %v3088_v1  ;;  %1340 = vmatprep.mubr.f32.mxu1 %v3088_v1 }
 0x380   :  { %2505 = vmatpush1.bf16.msra.mxu0 %v3248_v37  ;;  %2537 = vmatpush1.bf16.msra.mxu1 %v3252_v40 }
 0x381   :  { %2507 = vmatprep.subr.bf16.mxu0 %v3256_v44  ;;  %2539 = vmatprep.subr.bf16.mxu1 %v3260_v49 }
 0x384   :  { %2509 = vmatpush1.bf16.msra.mxu0 %v3264_v52  ;;  %2541 = vmatpush1.bf16.msra.mxu1 %v3268_v56 }
 0x385   :  { %2511 = vmatprep.subr.bf16.mxu0 %v3272_v60  ;;  %2543 = vmatprep.subr.bf16.mxu1 %v3276_v63 }
 0x388   :  { %2513 = vmatpush1.bf16.msra.mxu0 %v3280_v4  ;;  %2545 = vmatpush1.bf16.msra.mxu1 %v3284_v7 }
 0x389   :  { %2515 = vmatprep.subr.bf16.mxu0 %v3288_v10  ;;  %2547 = vmatprep.subr.bf16.mxu1 %v3292_v13 }
 0x38c   :  { %2517 = vmatpush1.bf16.msra.mxu0 %v3296_v17  ;;  %2549 = vmatpush1.bf16.msra.mxu1 %v3300_v21 }
 0x38d   :  { %2519 = vmatprep.subr.bf16.mxu0 %v3304_v26  ;;  %2551 = vmatprep.subr.bf16.mxu1 %v3308_v30 }
 0x390   :  { %2521 = vmatpush1.bf16.msra.mxu0 %v3312_v35  ;;  %2553 = vmatpush1.bf16.msra.mxu1 %v3316_v41 }
 0x391   :  { %2523 = vmatprep.subr.bf16.mxu0 %v3320_v45  ;;  %2555 = vmatprep.subr.bf16.mxu1 %v3324_v48 }
 0x394   :  { %2525 = vmatpush1.bf16.msra.mxu0 %v3328_v54  ;;  %2557 = vmatpush1.bf16.msra.mxu1 %v3332_v58 }
 0x395   :  { %2527 = vmatprep.subr.bf16.mxu0 %v3336_v62  ;;  %2559 = vmatprep.subr.bf16.mxu1 %v3340_v3 }
 0x398   :  { %2529 = vmatpush1.bf16.msra.mxu0 %v3344_v6  ;;  %2561 = vmatpush1.bf16.msra.mxu1 %v3348_v8 }
 0x399   :  { %2563 = vmatprep.subr.bf16.mxu0 %v3229_v19  ;;  %2595 = vmatprep.subr.bf16.mxu1 %v3233_v23 }
 0x44e   :  { %v1094_v11 = vpop.f32.mrb[6].mxu0  ;;  %v1165_v12 = vpop.f32.mrb[6].mxu1 }
 0x44f   :  { %v2784_v22 = vadd.f32 %v1094_v11, %v3400_v16  ;;  %v1096_v25 = vpop.f32.mrb[7].mxu0  ;;  %v1167_v28 = vpop.f32.mrb[7].mxu1  ;;  %v2800_v42 = vadd.f32 %v1165_v12, %v3409_v46 }
 0x450   :  { %v2785_v29 = vadd.f32 %v1096_v25, %v3402_v18  ;;  %v2801_v34 = vadd.f32 %v1167_v28, %v3406_v39 }
 0x451   :  { %v2150_v32 = vmul.f32 -1.442695, %v2784_v22 }
 0x452   :  { %v2151_v33 = vmul.f32 -1.442695, %v2785_v29  ;;  %v2152_v38 = vmul.f32 -1.442695, %v2801_v34 }
 0x453   :  { %2902 = vpow2.f32 %v2150_v32 }
 0x454   :  { %2904 = vpow2.f32 %v2151_v33 }
 0x455   :  { %2906 = vpow2.f32 %v2152_v38 }
 0x456   :  { %2908 = vtanh.f32 %v2800_v42 }
 0x45d   :  { %v2903_v43 = vpop.eup %2902 }
 0x45e   :  { %v2905_v47 = vpop.eup %2904  ;;  %v1177_v50 = vadd.f32 1.0, %v2903_v43 }
 0x45f   :  { %v1183_v51 = vadd.f32 1.0, %v2905_v47  ;;  %v2907_v53 = vpop.eup %2906 }
 0x460   :  { %2910 = vrcp.f32 %v1177_v50  ;;  %v2909_v55 = vpop.eup %2908  ;;  %v1190_v0 = vadd.f32 1.0, %v2907_v53 }
 0x461   :  { %2912 = vrcp.f32 %v1183_v51 }
 0x462   :  { %2914 = vrcp.f32 %v1190_v0 }
 0x46a   :  { %v2911_v57 = vpop.eup %2910 }
 0x46b   :  { %v2913_v59 = vpop.eup %2912  ;;  %v1194_v61 = vmul.f32 %v2911_v57, %v2909_v55 }
 0x46c   :  { %v1193_v2 = vmul.f32 %v2913_v59, %v3496_v9  ;;  %v2915_v14 = vpop.eup %2914 }
 0x46e   :  { %v3538_v5 = vadd.f32 %v1194_v61, %v1193_v2 }
 0x470   :  { %2916 = vtanh.f32 %v3538_v5 }
 0x47a   :  { %v2917_v15 = vpop.eup %2916 }
 0x47b   :  { %v1197_v20 = vmul.f32 %v2917_v15, %v2915_v14 }
 0x47d   :  { %1270 = vmatmul.mubr.f32.vlgmr.msra.gmra.mrb[8].mxu0 %v1197_v20  ;;  %1341 = vmatmul.mubr.f32.vlgmr.msra.gmra.mrb[8].mxu1 %v1197_v20 }
 0x47e   :  { %2565 = vmatpush1.bf16.msra.mxu0 %v3235_v24  ;;  %2597 = vmatpush1.bf16.msra.mxu1 %v3238_v27 }
 0x47f   :  { %2567 = vmatprep.subr.bf16.mxu0 %v3242_v31  ;;  %2599 = vmatprep.subr.bf16.mxu1 %v3246_v36 }
 0x480   :  { %1446 = vmatprep.mubr.f32.mxu0 %v3088_v1  ;;  %1517 = vmatprep.mubr.f32.mxu1 %v3088_v1 }
 0x482   :  { %2569 = vmatpush1.bf16.msra.mxu0 %v3248_v37  ;;  %2601 = vmatpush1.bf16.msra.mxu1 %v3252_v40 }
 0x483   :  { %2571 = vmatprep.subr.bf16.mxu0 %v3256_v44  ;;  %2603 = vmatprep.subr.bf16.mxu1 %v3260_v49 }
 0x486   :  { %2573 = vmatpush1.bf16.msra.mxu0 %v3264_v52  ;;  %2605 = vmatpush1.bf16.msra.mxu1 %v3268_v56 }
 0x487   :  { %2575 = vmatprep.subr.bf16.mxu0 %v3272_v60  ;;  %2607 = vmatprep.subr.bf16.mxu1 %v3276_v63 }
 0x48a   :  { %2577 = vmatpush1.bf16.msra.mxu0 %v3280_v4  ;;  %2609 = vmatpush1.bf16.msra.mxu1 %v3284_v7 }
 0x48b   :  { %2579 = vmatprep.subr.bf16.mxu0 %v3288_v10  ;;  %2611 = vmatprep.subr.bf16.mxu1 %v3292_v13 }
 0x48e   :  { %2581 = vmatpush1.bf16.msra.mxu0 %v3296_v17  ;;  %2613 = vmatpush1.bf16.msra.mxu1 %v3300_v21 }
 0x48f   :  { %2583 = vmatprep.subr.bf16.mxu0 %v3304_v26  ;;  %2615 = vmatprep.subr.bf16.mxu1 %v3308_v30 }
 0x492   :  { %2585 = vmatpush1.bf16.msra.mxu0 %v3312_v35  ;;  %2617 = vmatpush1.bf16.msra.mxu1 %v3316_v41 }
 0x493   :  { %2587 = vmatprep.subr.bf16.mxu0 %v3320_v45  ;;  %2619 = vmatprep.subr.bf16.mxu1 %v3324_v48 }
 0x496   :  { %2589 = vmatpush1.bf16.msra.mxu0 %v3328_v54  ;;  %2621 = vmatpush1.bf16.msra.mxu1 %v3332_v58 }
 0x497   :  { %2591 = vmatprep.subr.bf16.mxu0 %v3336_v62  ;;  %2623 = vmatprep.subr.bf16.mxu1 %v3340_v3 }
 0x49a   :  { %2593 = vmatpush1.bf16.msra.mxu0 %v3344_v6  ;;  %2625 = vmatpush1.bf16.msra.mxu1 %v3348_v8 }
 0x49b   :  { %2627 = vmatprep.subr.bf16.mxu0 %v3229_v19  ;;  %2659 = vmatprep.subr.bf16.mxu1 %v3233_v23 }
 0x550   :  { %v1271_v9 = vpop.f32.mrb[8].mxu0  ;;  %v1342_v11 = vpop.f32.mrb[8].mxu1 }
 0x551   :  { %v2786_v12 = vadd.f32 %v1271_v9, %v3400_v16  ;;  %v1273_v22 = vpop.f32.mrb[9].mxu0  ;;  %v1344_v25 = vpop.f32.mrb[9].mxu1  ;;  %v2802_v38 = vadd.f32 %v1342_v11, %v3409_v46 }
 0x552   :  { %v2787_v28 = vadd.f32 %v1273_v22, %v3402_v18  ;;  %v2803_v33 = vadd.f32 %v1344_v25, %v3406_v39 }
 0x553   :  { %v2153_v29 = vmul.f32 -1.442695, %v2786_v12 }
 0x554   :  { %v2154_v32 = vmul.f32 -1.442695, %v2787_v28  ;;  %v2155_v34 = vmul.f32 -1.442695, %v2803_v33 }
 0x555   :  { %2918 = vpow2.f32 %v2153_v29 }
 0x556   :  { %2920 = vpow2.f32 %v2154_v32 }
 0x557   :  { %2922 = vpow2.f32 %v2155_v34 }
 0x558   :  { %2924 = vtanh.f32 %v2802_v38 }
 0x55f   :  { %v2919_v42 = vpop.eup %2918 }
 0x560   :  { %v2921_v43 = vpop.eup %2920  ;;  %v1354_v47 = vadd.f32 1.0, %v2919_v42 }
 0x561   :  { %v1360_v50 = vadd.f32 1.0, %v2921_v43  ;;  %v2923_v51 = vpop.eup %2922 }
 0x562   :  { %2926 = vrcp.f32 %v1354_v47  ;;  %v2925_v53 = vpop.eup %2924  ;;  %v1367_v61 = vadd.f32 1.0, %v2923_v51 }
 0x563   :  { %2928 = vrcp.f32 %v1360_v50 }
 0x564   :  { %2930 = vrcp.f32 %v1367_v61 }
 0x56c   :  { %v2927_v55 = vpop.eup %2926 }
 0x56d   :  { %v2929_v57 = vpop.eup %2928  ;;  %v1371_v59 = vmul.f32 %v2927_v55, %v2925_v53 }
 0x56e   :  { %v1370_v0 = vmul.f32 %v2929_v57, %v3538_v5  ;;  %v2931_v14 = vpop.eup %2930 }
 0x570   :  { %v3580_v2 = vadd.f32 %v1371_v59, %v1370_v0 }
 0x572   :  { %2932 = vtanh.f32 %v3580_v2 }
 0x57c   :  { %v2933_v15 = vpop.eup %2932 }
 0x57d   :  { %v1374_v20 = vmul.f32 %v2933_v15, %v2931_v14  ;;  %v1909_v15 = vld [vmem:[#allocation9 + $0x18] sm:$0xff] }
 0x57f   :  { %1447 = vmatmul.mubr.f32.vlgmr.msra.gmra.mrb[10].mxu0 %v1374_v20  ;;  %1518 = vmatmul.mubr.f32.vlgmr.msra.gmra.mrb[10].mxu1 %v1374_v20 }
 0x580   :  { %2629 = vmatpush1.bf16.msra.mxu0 %v3235_v24  ;;  %2661 = vmatpush1.bf16.msra.mxu1 %v3238_v27 }
 0x581   :  { %2631 = vmatprep.subr.bf16.mxu0 %v3242_v31  ;;  %2663 = vmatprep.subr.bf16.mxu1 %v3246_v36 }
 0x582   :  { %1623 = vmatprep.mubr.f32.mxu0 %v3088_v1  ;;  %1694 = vmatprep.mubr.f32.mxu1 %v3088_v1 }
 0x584   :  { %2633 = vmatpush1.bf16.msra.mxu0 %v3248_v37  ;;  %2665 = vmatpush1.bf16.msra.mxu1 %v3252_v40 }
 0x585   :  { %2635 = vmatprep.subr.bf16.mxu0 %v3256_v44  ;;  %2667 = vmatprep.subr.bf16.mxu1 %v3260_v49 }
 0x588   :  { %2637 = vmatpush1.bf16.msra.mxu0 %v3264_v52  ;;  %2669 = vmatpush1.bf16.msra.mxu1 %v3268_v56 }
 0x589   :  { %2639 = vmatprep.subr.bf16.mxu0 %v3272_v60  ;;  %2671 = vmatprep.subr.bf16.mxu1 %v3276_v63 }
 0x58c   :  { %2641 = vmatpush1.bf16.msra.mxu0 %v3280_v4  ;;  %2673 = vmatpush1.bf16.msra.mxu1 %v3284_v7 }
 0x58d   :  { %2643 = vmatprep.subr.bf16.mxu0 %v3288_v10  ;;  %2675 = vmatprep.subr.bf16.mxu1 %v3292_v13 }
 0x590   :  { %2645 = vmatpush1.bf16.msra.mxu0 %v3296_v17  ;;  %2677 = vmatpush1.bf16.msra.mxu1 %v3300_v21 }
 0x591   :  { %2647 = vmatprep.subr.bf16.mxu0 %v3304_v26  ;;  %2679 = vmatprep.subr.bf16.mxu1 %v3308_v30 }
 0x594   :  { %2649 = vmatpush1.bf16.msra.mxu0 %v3312_v35  ;;  %2681 = vmatpush1.bf16.msra.mxu1 %v3316_v41 }
 0x595   :  { %2651 = vmatprep.subr.bf16.mxu0 %v3320_v45  ;;  %2683 = vmatprep.subr.bf16.mxu1 %v3324_v48 }
 0x598   :  { %2653 = vmatpush1.bf16.msra.mxu0 %v3328_v54  ;;  %2685 = vmatpush1.bf16.msra.mxu1 %v3332_v58 }
 0x599   :  { %2655 = vmatprep.subr.bf16.mxu0 %v3336_v62  ;;  %2687 = vmatprep.subr.bf16.mxu1 %v3340_v3 }
 0x59c   :  { %2657 = vmatpush1.bf16.msra.mxu0 %v3344_v6  ;;  %2689 = vmatpush1.bf16.msra.mxu1 %v3348_v8 }
 0x59d   :  { %2691 = vmatprep.subr.bf16.mxu0 %v3229_v19  ;;  %2723 = vmatprep.subr.bf16.mxu1 %v3233_v23 }
 0x652   :  { %v1448_v5 = vpop.f32.mrb[10].mxu0  ;;  %v1519_v9 = vpop.f32.mrb[10].mxu1 }
 0x653   :  { %v2788_v11 = vadd.f32 %v1448_v5, %v3400_v16  ;;  %v1450_v12 = vpop.f32.mrb[11].mxu0  ;;  %v1521_v22 = vpop.f32.mrb[11].mxu1  ;;  %v2804_v34 = vadd.f32 %v1519_v9, %v3409_v46  ;;  %v1910_v5 = vld [vmem:[#allocation9 + $0x20] sm:$0xff]  ;;  %v1911_v9 = vld [vmem:[#allocation9 + $0x28] sm:$0xff] }
 0x654   :  { %v2789_v25 = vadd.f32 %v1450_v12, %v3402_v18  ;;  %v2805_v32 = vadd.f32 %v1521_v22, %v3406_v39  ;;  %v1912_v12 = vld [vmem:[#allocation9 + $0x30] sm:$0xff]  ;;  %v1913_v22 = vld [vmem:[#allocation9 + $0x38] sm:$0xff] }
 0x655   :  { %v2156_v28 = vmul.f32 -1.442695, %v2788_v11  ;;  %v2761_v11 = vpack.c.bf16 %v1911_v9, %v1910_v5 }
 0x656   :  { %v2157_v29 = vmul.f32 -1.442695, %v2789_v25  ;;  %v2158_v33 = vmul.f32 -1.442695, %v2805_v32  ;;  %v2764_v25 = vpack.c.bf16 %v1913_v22, %v1912_v12 }
 0x657   :  { %2934 = vpow2.f32 %v2156_v28  ;;  %v1914_v28 = vld [vmem:[#allocation9 + $0x40] sm:$0xff] }
 0x658   :  { %2936 = vpow2.f32 %v2157_v29  ;;  %v1915_v29 = vld [vmem:[#allocation9 + $0x48] sm:$0xff] }
 0x659   :  { %2938 = vpow2.f32 %v2158_v33  ;;  %v2767_v32 = vpack.c.bf16 %v1915_v29, %v1914_v28  ;;  %v1916_v33 = vld [vmem:[#allocation9 + $0x50] sm:$0xff] }
 0x65a   :  { %2940 = vtanh.f32 %v2804_v34  ;;  %v1917_v34 = vld [vmem:[#allocation9 + $0x58] sm:$0xff] }
 0x661   :  { %v2935_v19 = vpop.eup %2934 }
 0x662   :  { %v2937_v38 = vpop.eup %2936  ;;  %v1531_v23 = vadd.f32 1.0, %v2935_v19  ;;  %v1918_v19 = vld [vmem:[#allocation9 + $0x60] sm:$0xff] }
 0x663   :  { %v1537_v42 = vadd.f32 1.0, %v2937_v38  ;;  %v2939_v43 = vpop.eup %2938  ;;  %v2770_v38 = vpack.c.bf16 %v1917_v34, %v1916_v33 }
 0x664   :  { %2942 = vrcp.f32 %v1531_v23  ;;  %v2941_v47 = vpop.eup %2940  ;;  %v1544_v55 = vadd.f32 1.0, %v2939_v43  ;;  %v1919_v23 = vld [vmem:[#allocation9 + $0x68] sm:$0xff]  ;;  %v1922_v43 = vld [vmem:[%s3689_s1] sm:$0xff] }
 0x665   :  { %2944 = vrcp.f32 %v1537_v42  ;;  %v1923_v42 = vld [vmem:[%s3694_s6] sm:$0x7] }
 0x666   :  { %2946 = vrcp.f32 %v1544_v55 }
 0x66e   :  { %v2943_v50 = vpop.eup %2942 }
 0x66f   :  { %v2945_v51 = vpop.eup %2944  ;;  %v1548_v53 = vmul.f32 %v2943_v50, %v2941_v47  ;;  %v2773_v47 = vpack.c.bf16 %v1919_v23, %v1918_v19  ;;  %v1920_v50 = vld [vmem:[#allocation9 + $0x70] sm:$0xff] }
 0x670   :  { %v1547_v57 = vmul.f32 %v2945_v51, %v3580_v2  ;;  %v2947_v61 = vpop.eup %2946  ;;  %v1908_v2 = vld [vmem:[#allocation9 + $0x10] sm:$0xff]  ;;  %v1921_v51 = vld [vmem:[#allocation9 + $0x78] sm:$0xff] }
 0x671   :  { %v2758_v20 = vpack.c.bf16 %v1909_v15, %v1908_v2 }
 0x672   :  { %v3622_v59 = vadd.f32 %v1548_v53, %v1547_v57  ;;  %v2776_v53 = vpack.c.bf16 %v1921_v51, %v1920_v50 }
 0x674   :  { %2948 = vtanh.f32 %v3622_v59 }
 0x67e   :  { %v2949_v0 = vpop.eup %2948 }
 0x67f   :  { %v1551_v14 = vmul.f32 %v2949_v0, %v2947_v61 }
 0x681   :  { %1624 = vmatmul.mubr.f32.vlgmr.msra.gmra.mrb[12].mxu0 %v1551_v14  ;;  %1695 = vmatmul.mubr.f32.vlgmr.msra.gmra.mrb[12].mxu1 %v1551_v14 }
 0x682   :  { %2693 = vmatpush1.bf16.msra.mxu0 %v3235_v24  ;;  %2725 = vmatpush1.bf16.msra.mxu1 %v3238_v27 }
 0x683   :  { %2695 = vmatprep.subr.bf16.mxu0 %v3242_v31  ;;  %2727 = vmatprep.subr.bf16.mxu1 %v3246_v36 }
 0x684   :  { %1800 = vmatprep.mubr.f32.mxu0 %v3088_v1  ;;  %1871 = vmatprep.mubr.f32.mxu1 %v3088_v1 }
 0x686   :  { %2697 = vmatpush1.bf16.msra.mxu0 %v3248_v37  ;;  %2729 = vmatpush1.bf16.msra.mxu1 %v3252_v40 }
 0x687   :  { %2699 = vmatprep.subr.bf16.mxu0 %v3256_v44  ;;  %2731 = vmatprep.subr.bf16.mxu1 %v3260_v49 }
 0x68a   :  { %2701 = vmatpush1.bf16.msra.mxu0 %v3264_v52  ;;  %2733 = vmatpush1.bf16.msra.mxu1 %v3268_v56 }
 0x68b   :  { %2703 = vmatprep.subr.bf16.mxu0 %v3272_v60  ;;  %2735 = vmatprep.subr.bf16.mxu1 %v3276_v63 }
 0x68e   :  { %2705 = vmatpush1.bf16.msra.mxu0 %v3280_v4  ;;  %2737 = vmatpush1.bf16.msra.mxu1 %v3284_v7 }
 0x68f   :  { %2707 = vmatprep.subr.bf16.mxu0 %v3288_v10  ;;  %2739 = vmatprep.subr.bf16.mxu1 %v3292_v13 }
 0x692   :  { %2709 = vmatpush1.bf16.msra.mxu0 %v3296_v17  ;;  %2741 = vmatpush1.bf16.msra.mxu1 %v3300_v21 }
 0x693   :  { %2711 = vmatprep.subr.bf16.mxu0 %v3304_v26  ;;  %2743 = vmatprep.subr.bf16.mxu1 %v3308_v30 }
 0x696   :  { %2713 = vmatpush1.bf16.msra.mxu0 %v3312_v35  ;;  %2745 = vmatpush1.bf16.msra.mxu1 %v3316_v41 }
 0x697   :  { %2715 = vmatprep.subr.bf16.mxu0 %v3320_v45  ;;  %2747 = vmatprep.subr.bf16.mxu1 %v3324_v48 }
 0x69a   :  { %2717 = vmatpush1.bf16.msra.mxu0 %v3328_v54  ;;  %2749 = vmatpush1.bf16.msra.mxu1 %v3332_v58 }
 0x69b   :  { %2719 = vmatprep.subr.bf16.mxu0 %v3336_v62  ;;  %2751 = vmatprep.subr.bf16.mxu1 %v3340_v3  ;;  %v1906_v62 = vld [vmem:[#allocation9] sm:$0xff]  ;;  %v1907_v3 = vld [vmem:[#allocation9 + $0x8] sm:$0xff] }
 0x69e   :  { %2721 = vmatpush1.bf16.msra.mxu0 %v3344_v6  ;;  %2753 = vmatpush1.bf16.msra.mxu1 %v3348_v8  ;;  %v2755_v6 = vpack.c.bf16 %v1907_v3, %v1906_v62  ;;  %v3090_v8 = vmov 0.0|0.0  }
 0x69f   :  { %2190 = vmatprep.subr.mxu0 %v3088_v1  ;;  %2754 = vmatprep.subr.bf16.mxu1 %v3090_v8 }
 0x754   :  { %v1625_v24 = vpop.f32.mrb[12].mxu0  ;;  %v1696_v27 = vpop.f32.mrb[12].mxu1 }
 0x755   :  { %v2790_v31 = vadd.f32 %v1625_v24, %v3400_v16  ;;  %v1627_v36 = vpop.f32.mrb[13].mxu0  ;;  %v1698_v37 = vpop.f32.mrb[13].mxu1  ;;  %v2806_v60 = vadd.f32 %v1696_v27, %v3409_v46 }
 0x756   :  { %v2791_v40 = vadd.f32 %v1627_v36, %v3402_v18  ;;  %v2807_v52 = vadd.f32 %v1698_v37, %v3406_v39 }
 0x757   :  { %v2159_v44 = vmul.f32 -1.442695, %v2790_v31 }
 0x758   :  { %v2160_v49 = vmul.f32 -1.442695, %v2791_v40  ;;  %v2161_v56 = vmul.f32 -1.442695, %v2807_v52 }
 0x759   :  { %2950 = vpow2.f32 %v2159_v44 }
 0x75a   :  { %2952 = vpow2.f32 %v2160_v49 }
 0x75b   :  { %2954 = vpow2.f32 %v2161_v56 }
 0x75c   :  { %2956 = vtanh.f32 %v2806_v60 }
 0x763   :  { %v2951_v63 = vpop.eup %2950 }
 0x764   :  { %v2953_v4 = vpop.eup %2952  ;;  %v1708_v7 = vadd.f32 1.0, %v2951_v63 }
 0x765   :  { %v1714_v10 = vadd.f32 1.0, %v2953_v4  ;;  %v2955_v13 = vpop.eup %2954 }
 0x766   :  { %2958 = vrcp.f32 %v1708_v7  ;;  %v2957_v17 = vpop.eup %2956  ;;  %v1721_v35 = vadd.f32 1.0, %v2955_v13 }
 0x767   :  { %2960 = vrcp.f32 %v1714_v10 }
 0x768   :  { %2962 = vrcp.f32 %v1721_v35 }
 0x770   :  { %v2959_v21 = vpop.eup %2958 }
 0x771   :  { %v2961_v26 = vpop.eup %2960  ;;  %v1725_v30 = vmul.f32 %v2959_v21, %v2957_v17 }
 0x772   :  { %v1724_v41 = vmul.f32 %v2961_v26, %v3622_v59  ;;  %v2963_v48 = vpop.eup %2962  ;;  %v2167_v26 = vld [vmem:[%s3695_s7] ss:$0 sm:$0xff] }
 0x774   :  { %v3663_v45 = vadd.f32 %v1725_v30, %v1724_v41 }
 0x776   :  { %2964 = vtanh.f32 %v3663_v45 }
 0x780   :  { %v2965_v54 = vpop.eup %2964 }
 0x781   :  { %v1728_v58 = vmul.f32 %v2965_v54, %v2963_v48 }
 0x783   :  { %1801 = vmatmul.mubr.f32.vlgmr.msra.gmra.mrb[14].mxu0 %v1728_v58  ;;  %1872 = vmatmul.mubr.f32.vlgmr.msra.gmra.mrb[14].mxu1 %v1728_v58  ;;  %v2169_v58 = vld [vmem:[#allocation3] ss:$0 sm:$0xff] }
 0x784   :  { %2756 = vmatpush3.bf16.msra.mxu1 %v2755_v6  ;;  %2192 = vmatprep.mubr.msk.f32.mxu0 %vm3091_vm6, %v3088_v1 }
 0x785   :  { %2757 = vmatprep.subr.bf16.mxu1 %v3090_v8  ;;  %2227 = vmatprep.mubr.msk.f32.mxu1 %vm3091_vm6, %v3088_v1 }
 0x786   :  { %2191 = vmatpush3.msk.msra.mxu0 %vm1928_vm4, %v1923_v42 }
 0x787   :  { %2193 = vmatmul.mubr.msk.f32.vlgmr.msra.gmra.mrb[16].mxu0 %vm1924_vm5, %v1922_v43 }
 0x788   :  { %2759 = vmatpush3.bf16.msra.mxu1 %v2758_v20 }
 0x789   :  { %2760 = vmatprep.subr.bf16.mxu1 %v3090_v8 }
 0x78c   :  { %2762 = vmatpush3.bf16.msra.mxu1 %v2761_v11 }
 0x78d   :  { %2763 = vmatprep.subr.bf16.mxu1 %v3090_v8 }
 0x790   :  { %2765 = vmatpush3.bf16.msra.mxu1 %v2764_v25 }
 0x791   :  { %2766 = vmatprep.subr.bf16.mxu1 %v3090_v8 }
 0x794   :  { %2768 = vmatpush3.bf16.msra.mxu1 %v2767_v32 }
 0x795   :  { %2769 = vmatprep.subr.bf16.mxu1 %v3090_v8 }
 0x798   :  { %2771 = vmatpush3.bf16.msra.mxu1 %v2770_v38 }
 0x799   :  { %2772 = vmatprep.subr.bf16.mxu1 %v3090_v8 }
 0x79c   :  { %2774 = vmatpush3.bf16.msra.mxu1 %v2773_v47 }
 0x79d   :  { %2775 = vmatprep.subr.bf16.mxu1 %v3090_v8 }
 0x7a0   :  { %2777 = vmatpush3.bf16.msra.mxu1 %v2776_v53 }
 0x856   :  { %v1802_v55 = vpop.f32.mrb[14].mxu0  ;;  %v1873_v57 = vpop.f32.mrb[14].mxu1 }
 0x857   :  { %v2792_v59 = vadd.f32 %v1802_v55, %v3400_v16  ;;  %v1804_v1 = vpop.f32.mrb[15].mxu0  ;;  %v1875_v61 = vpop.f32.mrb[15].mxu1  ;;  %v2808_v36 = vadd.f32 %v1873_v57, %v3409_v46 }
 0x858   :  { %v2793_v0 = vadd.f32 %v1804_v1, %v3402_v18  ;;  %v2809_v27 = vadd.f32 %v1875_v61, %v3406_v39 }
 0x859   :  { %v2162_v14 = vmul.f32 -1.442695, %v2792_v59 }
 0x85a   :  { %v2163_v24 = vmul.f32 -1.442695, %v2793_v0  ;;  %v2164_v31 = vmul.f32 -1.442695, %v2809_v27  ;;  %v1998_v13 = vpop.f32.mrb[16].mxu0 }
 0x85b   :  { %2966 = vpow2.f32 %v2162_v14  ;;  %v2194_v17 = vpop.f32.mrb[17].mxu0 }
 0x85c   :  { %2968 = vpow2.f32 %v2163_v24 }
 0x85d   :  { %2970 = vpow2.f32 %v2164_v31 }
 0x85e   :  { %2972 = vtanh.f32 %v2808_v36 }
 0x865   :  { %v2967_v37 = vpop.eup %2966 }
 0x866   :  { %v2969_v40 = vpop.eup %2968  ;;  %v1885_v44 = vadd.f32 1.0, %v2967_v37 }
 0x867   :  { %v1891_v49 = vadd.f32 1.0, %v2969_v40  ;;  %v2971_v16 = vpop.eup %2970 }
 0x868   :  { %2974 = vrcp.f32 %v1885_v44  ;;  %v2973_v52 = vpop.eup %2972  ;;  %v1898_v63 = vadd.f32 1.0, %v2971_v16 }
 0x869   :  { %2976 = vrcp.f32 %v1891_v49 }
 0x86a   :  { %2978 = vrcp.f32 %v1898_v63 }
 0x872   :  { %v2975_v18 = vpop.eup %2974 }
 0x873   :  { %v2977_v56 = vpop.eup %2976  ;;  %v1902_v60 = vmul.f32 %v2975_v18, %v2973_v52 }
 0x874   :  { %v1901_v4 = vmul.f32 %v2977_v56, %v3663_v45  ;;  %v2979_v46 = vpop.eup %2978  ;;  %v2168_v45 = vld [vmem:[%s3696_s8] ss:$0 sm:$0xff] }
 0x876   :  { %v1903_v39 = vadd.f32 %v1902_v60, %v1901_v4 }
 0x878   :  { %2980 = vtanh.f32 %v1903_v39 }
 0x882   :  { %v2981_v7 = vpop.eup %2980 }
 0x883   :  { %v1905_v10 = vmul.f32 %v2981_v7, %v2979_v46 }
 0x885   :  { %2228 = vmatmul.mubr.f32.vlgmr.msra.gmra.mrb[16].mxu1 %v1905_v10 }
 0x958   :  { %v2068_v21 = vpop.f32.mrb[16].mxu1 }
 0x959   :  { %v2069_v30 = vadd.f32 %v2068_v21, %v1998_v13  ;;  %v2229_v35 = vpop.f32.mrb[17].mxu1 }
 0x95b   :  { %v2079_v41 = vadd.f32 %v2167_v26, %v2069_v30 }
 0x95d   :  { %v2080_v48 = vmax.f32 %v2079_v41, 0.0 }
 0x95f   :  { %v2088_v54 = vmul.f32 %v2168_v45, %v2080_v48 }
 0x961   :  { %2089 = vadd.xlane.f32.xlu0 %v2088_v54 }
 0x9ee   :  { %v2090_v62 = vpop.xlane.xlu0 %2089 }
 0x9ef   :  { %v2098_v3 = vadd.f32 %v2169_v58, %v2090_v62 }
 0x9f1   :  { %v2170_v6 = vmul.f32 -1.442695, %v2098_v3 }
 0x9f3   :  { %2982 = vpow2.f32 %v2170_v6 }
 0x9fd   :  { %v2983_v8 = vpop.eup %2982 }
 0x9fe   :  { %v2102_v2 = vadd.f32 1.0, %v2983_v8 }
 0xa00   :  { %2984 = vrcp.f32 %v2102_v2 }
 0xa0a   :  { %v2985_v15 = vpop.eup %2984 }
 0xa0b   :  { %2106 = vst.msk [vmem:[%s3698_s10] sm:$0xff] %vm2105_vm7, %v2985_v15 }
 0xa0c   :  { %2111 = vsyncpa [#allocation5], 1 }
 0xa0d   :  { %2112 = vsyncpa [#allocation7], 1 }
 0xa0e   :  { %2113 = vsyncpa [#allocation10], 1 }

</bundles_post_ra>
